<compile_context>
chip_gen: v5e
topology: v5e:2x2
jax: 0.10.0
libtpu: 0.0.40
codegen_flags: <defaults>
</compile_context>

<pallas_src>
import jax
import jax.numpy as jnp
from jax.experimental import pallas as pl
from jax.experimental.pallas import tpu as pltpu

ANCHORS = [[1.08, 1.19], [3.42, 4.41], [6.63, 11.38], [9.42, 5.11], [16.62, 10.52]]
NUM_CLASSES = 8
NUM_ANCHORS = 5
BBOX_ATTRS = 7 + NUM_CLASSES          # 15 raw head channels
IGNORE_THRES = 0.6

_KATTRS = BBOX_ATTRS - 2               # 13 channels the loss actually reads
_TGT_CH = 8                            # mask, conf_mask, tx, ty, tw, th, tconf, label
_SUB = 8                               # sublane rows
_LANE = 128                            # lanes


# ----------------------------- Pallas kernel --------------------------------
def _region_loss_kernel(pred_ref, tgt_ref, out_ref):
    f32 = jnp.float32
    nc = pred_ref.shape[0] - 5                 # channels: x,y,w,h,conf,cls...
    lane_chunks = pred_ref.shape[2] // _LANE

    def lane_fold(v):                          # (G, L) -> (1, 128)
        r = jnp.sum(v, axis=0, keepdims=True)  # sublane reduce -> (1, L)
        acc = r[:, 0:_LANE]
        for i in range(1, lane_chunks):
            acc = acc + r[:, i * _LANE:(i + 1) * _LANE]
        return acc

    mask = tgt_ref[0]
    cmask = tgt_ref[1]
    tconf = tgt_ref[6]

    # conf_mask_false with ByteTensor "nonzero is True" semantics
    # (conf_mask - mask == -1 wraps to 255 and counts as selected).
    cf_false = (cmask - mask != 0.0).astype(f32)

    # Confidence BCE straight from logits (stable softplus form); matches
    # BCELoss(sigmoid(z), t) except for the -100 clamp in deep saturation.
    z = pred_ref[4].astype(f32)
    bce = (jnp.maximum(z, 0.0) - z * tconf +
           jnp.log(1.0 + jnp.exp(-jnp.abs(z))))

    n_true = jnp.sum(mask)

    def masked_terms():
        # Only runs on the (rare) tiles that actually contain a GT cell.
        tx, ty = tgt_ref[2], tgt_ref[3]
        tw, th = tgt_ref[4], tgt_ref[5]
        label = tgt_ref[7]
        sx = jax.nn.sigmoid(pred_ref[0].astype(f32))
        sy = jax.nn.sigmoid(pred_ref[1].astype(f32))
        pw = pred_ref[2].astype(f32)
        ph = pred_ref[3].astype(f32)
        coord = ((sx - tx) ** 2 + (sy - ty) ** 2 +
                 (pw - tw) ** 2 + (ph - th) ** 2)
        # Class CE on sigmoid "probs" (reference applies sigmoid, then
        # nn.CrossEntropyLoss): logsumexp(pcls) - pcls[label].
        esum = jnp.zeros_like(mask)
        picked = jnp.zeros_like(mask)
        for ci in range(nc):
            pc = jax.nn.sigmoid(pred_ref[5 + ci].astype(f32))
            esum = esum + jnp.exp(pc)
            picked = picked + jnp.where(label == float(ci), pc, 0.0)
        ce = jnp.log(esum) - picked
        return (lane_fold(mask * coord),
                lane_fold(mask * bce),
                lane_fold(mask * ce))

    def no_gt():
        zero = jnp.zeros((1, _LANE), f32)
        return zero, zero, zero

    coord_row, ctrue_row, cls_row = jax.lax.cond(n_true > 0.0,
                                                 masked_terms, no_gt)

    zero_row = jnp.zeros((_LANE,), f32)
    out_ref[0, 0, 0, :] = lane_fold(mask)[0]            # n_true
    out_ref[0, 0, 1, :] = lane_fold(cf_false)[0]        # n_false
    out_ref[0, 0, 2, :] = coord_row[0]                  # coord MSE sum
    out_ref[0, 0, 3, :] = lane_fold(cf_false * bce)[0]  # conf-false BCE sum
    out_ref[0, 0, 4, :] = ctrue_row[0]                  # conf-true BCE sum
    out_ref[0, 0, 5, :] = cls_row[0]                    # class CE sum
    out_ref[0, 0, 6, :] = zero_row
    out_ref[0, 0, 7, :] = zero_row


# ------------------------------ block sizing --------------------------------
def _choose_blocks(nba, hw_pad):
    """Pick (row_block, lane_block).  Lane block: the largest multiple of 128
    that divides hw_pad (long contiguous DMA runs), capped at 4096 lanes.
    Row block: multiple of 8, sized so the double-buffered (pred+tgt) block
    footprint stays <= ~8 MiB (inside v5e's 16 MiB / v7x's 32 MiB scoped VMEM
    defaults), while keeping >= 2 grid steps whenever possible so the
    ("parallel","parallel") grid can pipeline and split across v7x's TCs."""
    lane = _LANE
    for cand in (4096, 2048, 1024, 512, 256, 128):
        if hw_pad % cand == 0:
            lane = cand
            break
    n_lane_chunks = hw_pad // lane
    bytes_per_row8 = (_KATTRS + _TGT_CH) * 8 * lane * 4
    k = max(1, min(8, (4 * 1024 * 1024) // max(bytes_per_row8, 1)))
    k = 1 << (k.bit_length() - 1)          # power of two -> g in {8,16,32,64}
    g = 8 * k
    while g > 8 and ((nba + g - 1) // g) * n_lane_chunks < 2:
        g //= 2
    return g, lane


def region_loss_partial_sums(pred, tgt, g, lane):
    kattrs, nba_pad, hw_pad = pred.shape
    ni = nba_pad // g
    nj = hw_pad // lane
    return pl.pallas_call(
        _region_loss_kernel,
        out_shape=jax.ShapeDtypeStruct((ni, nj, 8, _LANE), jnp.float32),
        grid_spec=pltpu.PrefetchScalarGridSpec(
            num_scalar_prefetch=0,
            grid=(ni, nj),
            in_specs=[
                pl.BlockSpec((kattrs, g, lane), lambda i, j: (0, i, j)),
                pl.BlockSpec((_TGT_CH, g, lane), lambda i, j: (0, i, j)),
            ],
            out_specs=pl.BlockSpec((1, 1, 8, _LANE), lambda i, j: (i, j, 0, 0)),
        ),
        compiler_params=pltpu.CompilerParams(
            dimension_semantics=("parallel", "parallel"),   # 2-TC split on v7x
            vmem_limit_bytes=32 * 1024 * 1024),
    )(pred, tgt)


# --------------------------- target building (glue) -------------------------
def build_targets_packed(targets, anchors, nA, nH, nW, ignore_thres,
                         nba_pad, hw_pad):
    """Faithful port of build_targets, emitted directly in the (8, nB*nA, HW)
    layout the kernel consumes.  Sequential GT semantics are preserved via a
    single fori_loop (no unrolled per-GT scatter chain)."""
    nB, nT, _ = targets.shape
    hw = nH * nW
    f32 = jnp.float32
    aw = anchors[:, 0]
    ah = anchors[:, 1]
    area_a = (aw + 1.0) * (ah + 1.0)

    tgt = jnp.zeros((_TGT_CH, nba_pad, hw_pad), f32)
    # conf_mask defaults to 1 only inside the real (rows, cells) region, so
    # row/lane padding contributes nothing to the conf-false term.
    row_ok = (jnp.arange(nba_pad) < nB * nA)[:, None]
    col_ok = (jnp.arange(hw_pad) < hw)[None, :]
    tgt = tgt.at[1].set(jnp.where(row_ok & col_ok, 1.0, 0.0))

    def body(i, tgt):
        b = i // nT
        t = i - b * nT
        row = targets[b, t]                       # (5,)
        valid = jnp.sum(row) != 0.0
        label = row[0]
        gx = row[1] * nW
        gy = row[2] * nH
        gw = row[3] * nW
        gl = row[4] * nH
        # clamp so a normalized coordinate of exactly 1.0 stays in-grid
        gi = jnp.clip(gx.astype(jnp.int32), 0, nW - 1)
        gj = jnp.clip(gy.astype(jnp.int32), 0, nH - 1)
        col = gj * nW + gi

        # anchor IoU (corner convention with the +1 terms of bbox_iou)
        inter = (jnp.maximum(jnp.minimum(gw, aw) + 1.0, 0.0) *
                 jnp.maximum(jnp.minimum(gl, ah) + 1.0, 0.0))
        area_g = (gw + 1.0) * (gl + 1.0)
        ious = inter / (area_g + area_a - inter + 1e-16)
        best_n = jnp.argmax(ious)

        # conf_mask[b, ious > thres, gj, gi] = 0
        rows_all = b * nA + jnp.arange(nA)
        cur = tgt[1, rows_all, col]
        tgt = tgt.at[1, rows_all, col].set(
            jnp.where(valid & (ious > ignore_thres), 0.0, cur))

        rb = b * nA + best_n
        cur8 = tgt[:, rb, col]                    # (8,)
        tw_v = jnp.log(gw / aw[best_n] + 1e-16)
        th_v = jnp.log(gl / ah[best_n] + 1e-16)
        # argmax over an accumulated one-hot == min label over all GT writes
        new_label = jnp.where(cur8[0] > 0, jnp.minimum(cur8[7], label), label)
        new8 = jnp.stack([1.0, 1.0,
                          gx - gi.astype(f32), gy - gj.astype(f32),
                          tw_v, th_v, 1.0, new_label])
        tgt = tgt.at[:, rb, col].set(jnp.where(valid, new8, cur8))
        return tgt

    return jax.lax.fori_loop(0, nB * nT, body, tgt)


# ------------------------------ forward wrapper ------------------------------
def region_loss_forward(x, targets):
    nB, ch, nH, nW = x.shape
    nA, attrs = NUM_ANCHORS, BBOX_ATTRS
    assert ch == nA * attrs
    hw = nH * nW
    hw_pad = ((hw + _LANE - 1) // _LANE) * _LANE
    nba = nB * nA
    anchors = jnp.asarray(ANCHORS, jnp.float32)

    g, lane = _choose_blocks(nba, hw_pad)
    nba_pad = ((nba + g - 1) // g) * g

    tgt = build_targets_packed(targets, anchors, nA, nH, nW,
                               IGNORE_THRES, nba_pad, hw_pad)

    # (nB, nA*attrs, nH, nW) -> (13, nB*nA, hw): one transpose copy that also
    # drops the unused im/re channels; pred keeps its input dtype (bf16 inputs
    # move half the bytes) and is widened to f32 inside the kernel at load.
    p = x.reshape(nB, nA, attrs, hw)
    p = jnp.concatenate([p[:, :, 0:4], p[:, :, 6:attrs]], axis=2)   # 13 chans
    pred = jnp.transpose(p, (2, 0, 1, 3)).reshape(_KATTRS, nba, hw)
    if nba_pad != nba or hw_pad != hw:      # no-op for aligned shapes
        pred = jnp.pad(pred, ((0, 0), (0, nba_pad - nba), (0, hw_pad - hw)))

    parts = region_loss_partial_sums(pred, tgt, g, lane)   # (ni, nj, 8, 128)
    sums = jnp.sum(parts, axis=(0, 1, 3))                  # (8,)

    n_true = sums[0]        # number of GT-assigned cells (mask sum)
    n_false = sums[1]       # number of conf_mask_false cells
    # NOTE: if a batch has zero valid ground truths, n_true == 0 and the loss
    # is NaN exactly like the PyTorch reference (mean over an empty selection).
    loss_coord = sums[2] / n_true                          # loss_x+y+w+h
    loss_conf = sums[3] / n_false + sums[4] / n_true
    loss_cls = (1.0 / nB) * (sums[5] / n_true)
    # TODO(synk): nGT/nCorrect/recall/precision only feed a removed print in
    # the reference and do not affect the returned loss; not computed here.
    return loss_coord + loss_conf + loss_cls


if __name__ == "__main__":
    key = jax.random.PRNGKey(0)
    nB, nH, nW = 2, 16, 16
    x = 0.5 * jax.random.normal(
        key, (nB, NUM_ANCHORS * BBOX_ATTRS, nH, nW), dtype=jnp.float32)
    # targets: (nB, nT, 5) = [class, x, y, w, l] normalized; zero rows = padding
    targets = jnp.array(
        [[[1.0, 0.30, 0.40, 0.20, 0.25],
          [4.0, 0.70, 0.60, 0.40, 0.50],
          [0.0, 0.00, 0.00, 0.00, 0.00]],
         [[2.0, 0.15, 0.85, 0.10, 0.30],
          [7.0, 0.55, 0.25, 0.60, 0.70],
          [0.0, 0.00, 0.00, 0.00, 0.00]]], dtype=jnp.float32)

    loss = jax.jit(region_loss_forward)(x, targets)
    loss = jax.block_until_ready(loss)
    assert bool(jnp.isfinite(loss)), f"loss not finite: {loss}"
    print("KERNEL_OK")
</pallas_src>

<mosaic_0001>
module attributes {stable_mosaic.version = 11 : i64} {
  func.func @_region_loss_kernel(%arg0: i32, %arg1: i32, %arg2: memref<13x8x256xf32, #tpu.memory_space<vmem>>, %arg3: memref<8x8x256xf32, #tpu.memory_space<vmem>>, %arg4: memref<1x1x8x128xf32, #tpu.memory_space<vmem>>) attributes {dimension_semantics = [#tpu.dimension_semantics<parallel>, #tpu.dimension_semantics<parallel>], iteration_bounds = array<i64: 2, 1>, scalar_prefetch = 0 : i64, scratch_operands = 0 : i64, tpu.core_type = #tpu.core_type<tc>, window_params = [{transform_indices = @transform_0, window_bounds = array<i64: 13, 8, 256>}, {transform_indices = @transform_1, window_bounds = array<i64: 8, 8, 256>}, {transform_indices = @transform_2, window_bounds = array<i64: 1, 1, 8, 128>}]} {
    %c0 = arith.constant 0 : index
    %c0_0 = arith.constant 0 : index
    %c0_1 = arith.constant 0 : index
    %0 = vector.load %arg3[%c0, %c0_0, %c0_1] : memref<8x8x256xf32, #tpu.memory_space<vmem>>, vector<1x8x256xf32>
    %1 = vector.shape_cast %0 : vector<1x8x256xf32> to vector<8x256xf32>
    %c1 = arith.constant 1 : index
    %c0_2 = arith.constant 0 : index
    %c0_3 = arith.constant 0 : index
    %2 = vector.load %arg3[%c1, %c0_2, %c0_3] : memref<8x8x256xf32, #tpu.memory_space<vmem>>, vector<1x8x256xf32>
    %3 = vector.shape_cast %2 : vector<1x8x256xf32> to vector<8x256xf32>
    %c6 = arith.constant 6 : index
    %c0_4 = arith.constant 0 : index
    %c0_5 = arith.constant 0 : index
    %4 = vector.load %arg3[%c6, %c0_4, %c0_5] : memref<8x8x256xf32, #tpu.memory_space<vmem>>, vector<1x8x256xf32>
    %5 = vector.shape_cast %4 : vector<1x8x256xf32> to vector<8x256xf32>
    %6 = arith.subf %3, %1 : vector<8x256xf32>
    %cst = arith.constant 0.000000e+00 : f32
    %7 = vector.broadcast %cst : f32 to vector<8x256xf32>
    %8 = arith.cmpf one, %6, %7 : vector<8x256xf32>
    %9 = arith.extui %8 : vector<8x256xi1> to vector<8x256xi32>
    %10 = arith.sitofp %9 : vector<8x256xi32> to vector<8x256xf32>
    %c4 = arith.constant 4 : index
    %c0_6 = arith.constant 0 : index
    %c0_7 = arith.constant 0 : index
    %11 = vector.load %arg2[%c4, %c0_6, %c0_7] : memref<13x8x256xf32, #tpu.memory_space<vmem>>, vector<1x8x256xf32>
    %12 = vector.shape_cast %11 : vector<1x8x256xf32> to vector<8x256xf32>
    %cst_8 = arith.constant 0.000000e+00 : f32
    %13 = vector.broadcast %cst_8 : f32 to vector<8x256xf32>
    %14 = arith.maximumf %12, %13 : vector<8x256xf32>
    %15 = arith.mulf %12, %5 : vector<8x256xf32>
    %16 = arith.subf %14, %15 : vector<8x256xf32>
    %17 = math.absf %12 : vector<8x256xf32>
    %cst_9 = arith.constant 0.000000e+00 : f32
    %18 = vector.broadcast %cst_9 : f32 to vector<8x256xf32>
    %19 = arith.subf %18, %17 : vector<8x256xf32>
    %20 = math.exp %19 : vector<8x256xf32>
    %cst_10 = arith.constant 1.000000e+00 : f32
    %21 = vector.broadcast %cst_10 : f32 to vector<8x256xf32>
    %22 = arith.addf %21, %20 : vector<8x256xf32>
    %23 = math.log %22 : vector<8x256xf32>
    %24 = arith.addf %16, %23 : vector<8x256xf32>
    %25 = vector.shape_cast %1 : vector<8x256xf32> to vector<1x8x256xf32>
    %cst_11 = arith.constant dense<0.000000e+00> : vector<1xf32>
    %26 = vector.multi_reduction <add>, %25, %cst_11 [1, 2] : vector<1x8x256xf32> to vector<1xf32>
    %27 = vector.shape_cast %26 : vector<1xf32> to vector<1x1x1xf32>
    %28 = vector.extract %27[0, 0, 0] : f32 from vector<1x1x1xf32>
    %cst_12 = arith.constant 0.000000e+00 : f32
    %29 = arith.cmpf ogt, %28, %cst_12 : f32
    %30 = arith.extui %29 : i1 to i32
    %c0_i32 = arith.constant 0 : i32
    %31 = arith.cmpi ne, %30, %c0_i32 : i32
    %32:3 = scf.if %31 -> (vector<1x128xf32>, vector<1x128xf32>, vector<1x128xf32>) {
      %c2_45 = arith.constant 2 : index
      %c0_46 = arith.constant 0 : index
      %c0_47 = arith.constant 0 : index
      %80 = vector.load %arg3[%c2_45, %c0_46, %c0_47] : memref<8x8x256xf32, #tpu.memory_space<vmem>>, vector<1x8x256xf32>
      %81 = vector.shape_cast %80 : vector<1x8x256xf32> to vector<8x256xf32>
      %c3_48 = arith.constant 3 : index
      %c0_49 = arith.constant 0 : index
      %c0_50 = arith.constant 0 : index
      %82 = vector.load %arg3[%c3_48, %c0_49, %c0_50] : memref<8x8x256xf32, #tpu.memory_space<vmem>>, vector<1x8x256xf32>
      %83 = vector.shape_cast %82 : vector<1x8x256xf32> to vector<8x256xf32>
      %c4_51 = arith.constant 4 : index
      %c0_52 = arith.constant 0 : index
      %c0_53 = arith.constant 0 : index
      %84 = vector.load %arg3[%c4_51, %c0_52, %c0_53] : memref<8x8x256xf32, #tpu.memory_space<vmem>>, vector<1x8x256xf32>
      %85 = vector.shape_cast %84 : vector<1x8x256xf32> to vector<8x256xf32>
      %c5_54 = arith.constant 5 : index
      %c0_55 = arith.constant 0 : index
      %c0_56 = arith.constant 0 : index
      %86 = vector.load %arg3[%c5_54, %c0_55, %c0_56] : memref<8x8x256xf32, #tpu.memory_space<vmem>>, vector<1x8x256xf32>
      %87 = vector.shape_cast %86 : vector<1x8x256xf32> to vector<8x256xf32>
      %c7_57 = arith.constant 7 : index
      %c0_58 = arith.constant 0 : index
      %c0_59 = arith.constant 0 : index
      %88 = vector.load %arg3[%c7_57, %c0_58, %c0_59] : memref<8x8x256xf32, #tpu.memory_space<vmem>>, vector<1x8x256xf32>
      %89 = vector.shape_cast %88 : vector<1x8x256xf32> to vector<8x256xf32>
      %c0_60 = arith.constant 0 : index
      %c0_61 = arith.constant 0 : index
      %c0_62 = arith.constant 0 : index
      %90 = vector.load %arg2[%c0_60, %c0_61, %c0_62] : memref<13x8x256xf32, #tpu.memory_space<vmem>>, vector<1x8x256xf32>
      %91 = vector.shape_cast %90 : vector<1x8x256xf32> to vector<8x256xf32>
      %92 = arith.negf %91 : vector<8x256xf32>
      %93 = math.exp %92 : vector<8x256xf32>
      %cst_63 = arith.constant 1.000000e+00 : f32
      %94 = vector.broadcast %cst_63 : f32 to vector<8x256xf32>
      %95 = arith.addf %94, %93 : vector<8x256xf32>
      %96 = arith.divf %94, %95 : vector<8x256xf32>
      %c1_64 = arith.constant 1 : index
      %c0_65 = arith.constant 0 : index
      %c0_66 = arith.constant 0 : index
      %97 = vector.load %arg2[%c1_64, %c0_65, %c0_66] : memref<13x8x256xf32, #tpu.memory_space<vmem>>, vector<1x8x256xf32>
      %98 = vector.shape_cast %97 : vector<1x8x256xf32> to vector<8x256xf32>
      %99 = arith.negf %98 : vector<8x256xf32>
      %100 = math.exp %99 : vector<8x256xf32>
      %cst_67 = arith.constant 1.000000e+00 : f32
      %101 = vector.broadcast %cst_67 : f32 to vector<8x256xf32>
      %102 = arith.addf %101, %100 : vector<8x256xf32>
      %103 = arith.divf %101, %102 : vector<8x256xf32>
      %c2_68 = arith.constant 2 : index
      %c0_69 = arith.constant 0 : index
      %c0_70 = arith.constant 0 : index
      %104 = vector.load %arg2[%c2_68, %c0_69, %c0_70] : memref<13x8x256xf32, #tpu.memory_space<vmem>>, vector<1x8x256xf32>
      %105 = vector.shape_cast %104 : vector<1x8x256xf32> to vector<8x256xf32>
      %c3_71 = arith.constant 3 : index
      %c0_72 = arith.constant 0 : index
      %c0_73 = arith.constant 0 : index
      %106 = vector.load %arg2[%c3_71, %c0_72, %c0_73] : memref<13x8x256xf32, #tpu.memory_space<vmem>>, vector<1x8x256xf32>
      %107 = vector.shape_cast %106 : vector<1x8x256xf32> to vector<8x256xf32>
      %108 = arith.subf %96, %81 : vector<8x256xf32>
      %109 = arith.mulf %108, %108 : vector<8x256xf32>
      %110 = arith.subf %103, %83 : vector<8x256xf32>
      %111 = arith.mulf %110, %110 : vector<8x256xf32>
      %112 = arith.addf %109, %111 : vector<8x256xf32>
      %113 = arith.subf %105, %85 : vector<8x256xf32>
      %114 = arith.mulf %113, %113 : vector<8x256xf32>
      %115 = arith.addf %112, %114 : vector<8x256xf32>
      %116 = arith.subf %107, %87 : vector<8x256xf32>
      %117 = arith.mulf %116, %116 : vector<8x256xf32>
      %118 = arith.addf %115, %117 : vector<8x256xf32>
      %cst_74 = arith.constant 0.000000e+00 : f32
      %119 = vector.broadcast %cst_74 : f32 to vector<8x256xf32>
      %cst_75 = arith.constant 0.000000e+00 : f32
      %120 = vector.broadcast %cst_75 : f32 to vector<8x256xf32>
      %c5_76 = arith.constant 5 : index
      %c0_77 = arith.constant 0 : index
      %c0_78 = arith.constant 0 : index
      %121 = vector.load %arg2[%c5_76, %c0_77, %c0_78] : memref<13x8x256xf32, #tpu.memory_space<vmem>>, vector<1x8x256xf32>
      %122 = vector.shape_cast %121 : vector<1x8x256xf32> to vector<8x256xf32>
      %123 = arith.negf %122 : vector<8x256xf32>
      %124 = math.exp %123 : vector<8x256xf32>
      %cst_79 = arith.constant 1.000000e+00 : f32
      %125 = vector.broadcast %cst_79 : f32 to vector<8x256xf32>
      %126 = arith.addf %125, %124 : vector<8x256xf32>
      %127 = arith.divf %125, %126 : vector<8x256xf32>
      %128 = math.exp %127 : vector<8x256xf32>
      %129 = arith.addf %119, %128 : vector<8x256xf32>
      %cst_80 = arith.constant 0.000000e+00 : f32
      %130 = vector.broadcast %cst_80 : f32 to vector<8x256xf32>
      %131 = arith.cmpf oeq, %89, %130 : vector<8x256xf32>
      %cst_81 = arith.constant 0.000000e+00 : f32
      %132 = vector.broadcast %cst_81 : f32 to vector<8x256xf32>
      %133 = arith.select %131, %127, %132 : vector<8x256xi1>, vector<8x256xf32>
      %134 = arith.addf %120, %133 : vector<8x256xf32>
      %c6_82 = arith.constant 6 : index
      %c0_83 = arith.constant 0 : index
      %c0_84 = arith.constant 0 : index
      %135 = vector.load %arg2[%c6_82, %c0_83, %c0_84] : memref<13x8x256xf32, #tpu.memory_space<vmem>>, vector<1x8x256xf32>
      %136 = vector.shape_cast %135 : vector<1x8x256xf32> to vector<8x256xf32>
      %137 = arith.negf %136 : vector<8x256xf32>
      %138 = math.exp %137 : vector<8x256xf32>
      %cst_85 = arith.constant 1.000000e+00 : f32
      %139 = vector.broadcast %cst_85 : f32 to vector<8x256xf32>
      %140 = arith.addf %139, %138 : vector<8x256xf32>
      %141 = arith.divf %139, %140 : vector<8x256xf32>
      %142 = math.exp %141 : vector<8x256xf32>
      %143 = arith.addf %129, %142 : vector<8x256xf32>
      %cst_86 = arith.constant 1.000000e+00 : f32
      %144 = vector.broadcast %cst_86 : f32 to vector<8x256xf32>
      %145 = arith.cmpf oeq, %89, %144 : vector<8x256xf32>
      %cst_87 = arith.constant 0.000000e+00 : f32
      %146 = vector.broadcast %cst_87 : f32 to vector<8x256xf32>
      %147 = arith.select %145, %141, %146 : vector<8x256xi1>, vector<8x256xf32>
      %148 = arith.addf %134, %147 : vector<8x256xf32>
      %c7_88 = arith.constant 7 : index
      %c0_89 = arith.constant 0 : index
      %c0_90 = arith.constant 0 : index
      %149 = vector.load %arg2[%c7_88, %c0_89, %c0_90] : memref<13x8x256xf32, #tpu.memory_space<vmem>>, vector<1x8x256xf32>
      %150 = vector.shape_cast %149 : vector<1x8x256xf32> to vector<8x256xf32>
      %151 = arith.negf %150 : vector<8x256xf32>
      %152 = math.exp %151 : vector<8x256xf32>
      %cst_91 = arith.constant 1.000000e+00 : f32
      %153 = vector.broadcast %cst_91 : f32 to vector<8x256xf32>
      %154 = arith.addf %153, %152 : vector<8x256xf32>
      %155 = arith.divf %153, %154 : vector<8x256xf32>
      %156 = math.exp %155 : vector<8x256xf32>
      %157 = arith.addf %143, %156 : vector<8x256xf32>
      %cst_92 = arith.constant 2.000000e+00 : f32
      %158 = vector.broadcast %cst_92 : f32 to vector<8x256xf32>
      %159 = arith.cmpf oeq, %89, %158 : vector<8x256xf32>
      %cst_93 = arith.constant 0.000000e+00 : f32
      %160 = vector.broadcast %cst_93 : f32 to vector<8x256xf32>
      %161 = arith.select %159, %155, %160 : vector<8x256xi1>, vector<8x256xf32>
      %162 = arith.addf %148, %161 : vector<8x256xf32>
      %c8 = arith.constant 8 : index
      %c0_94 = arith.constant 0 : index
      %c0_95 = arith.constant 0 : index
      %163 = vector.load %arg2[%c8, %c0_94, %c0_95] : memref<13x8x256xf32, #tpu.memory_space<vmem>>, vector<1x8x256xf32>
      %164 = vector.shape_cast %163 : vector<1x8x256xf32> to vector<8x256xf32>
      %165 = arith.negf %164 : vector<8x256xf32>
      %166 = math.exp %165 : vector<8x256xf32>
      %cst_96 = arith.constant 1.000000e+00 : f32
      %167 = vector.broadcast %cst_96 : f32 to vector<8x256xf32>
      %168 = arith.addf %167, %166 : vector<8x256xf32>
      %169 = arith.divf %167, %168 : vector<8x256xf32>
      %170 = math.exp %169 : vector<8x256xf32>
      %171 = arith.addf %157, %170 : vector<8x256xf32>
      %cst_97 = arith.constant 3.000000e+00 : f32
      %172 = vector.broadcast %cst_97 : f32 to vector<8x256xf32>
      %173 = arith.cmpf oeq, %89, %172 : vector<8x256xf32>
      %cst_98 = arith.constant 0.000000e+00 : f32
      %174 = vector.broadcast %cst_98 : f32 to vector<8x256xf32>
      %175 = arith.select %173, %169, %174 : vector<8x256xi1>, vector<8x256xf32>
      %176 = arith.addf %162, %175 : vector<8x256xf32>
      %c9 = arith.constant 9 : index
      %c0_99 = arith.constant 0 : index
      %c0_100 = arith.constant 0 : index
      %177 = vector.load %arg2[%c9, %c0_99, %c0_100] : memref<13x8x256xf32, #tpu.memory_space<vmem>>, vector<1x8x256xf32>
      %178 = vector.shape_cast %177 : vector<1x8x256xf32> to vector<8x256xf32>
      %179 = arith.negf %178 : vector<8x256xf32>
      %180 = math.exp %179 : vector<8x256xf32>
      %cst_101 = arith.constant 1.000000e+00 : f32
      %181 = vector.broadcast %cst_101 : f32 to vector<8x256xf32>
      %182 = arith.addf %181, %180 : vector<8x256xf32>
      %183 = arith.divf %181, %182 : vector<8x256xf32>
      %184 = math.exp %183 : vector<8x256xf32>
      %185 = arith.addf %171, %184 : vector<8x256xf32>
      %cst_102 = arith.constant 4.000000e+00 : f32
      %186 = vector.broadcast %cst_102 : f32 to vector<8x256xf32>
      %187 = arith.cmpf oeq, %89, %186 : vector<8x256xf32>
      %cst_103 = arith.constant 0.000000e+00 : f32
      %188 = vector.broadcast %cst_103 : f32 to vector<8x256xf32>
      %189 = arith.select %187, %183, %188 : vector<8x256xi1>, vector<8x256xf32>
      %190 = arith.addf %176, %189 : vector<8x256xf32>
      %c10 = arith.constant 10 : index
      %c0_104 = arith.constant 0 : index
      %c0_105 = arith.constant 0 : index
      %191 = vector.load %arg2[%c10, %c0_104, %c0_105] : memref<13x8x256xf32, #tpu.memory_space<vmem>>, vector<1x8x256xf32>
      %192 = vector.shape_cast %191 : vector<1x8x256xf32> to vector<8x256xf32>
      %193 = arith.negf %192 : vector<8x256xf32>
      %194 = math.exp %193 : vector<8x256xf32>
      %cst_106 = arith.constant 1.000000e+00 : f32
      %195 = vector.broadcast %cst_106 : f32 to vector<8x256xf32>
      %196 = arith.addf %195, %194 : vector<8x256xf32>
      %197 = arith.divf %195, %196 : vector<8x256xf32>
      %198 = math.exp %197 : vector<8x256xf32>
      %199 = arith.addf %185, %198 : vector<8x256xf32>
      %cst_107 = arith.constant 5.000000e+00 : f32
      %200 = vector.broadcast %cst_107 : f32 to vector<8x256xf32>
      %201 = arith.cmpf oeq, %89, %200 : vector<8x256xf32>
      %cst_108 = arith.constant 0.000000e+00 : f32
      %202 = vector.broadcast %cst_108 : f32 to vector<8x256xf32>
      %203 = arith.select %201, %197, %202 : vector<8x256xi1>, vector<8x256xf32>
      %204 = arith.addf %190, %203 : vector<8x256xf32>
      %c11 = arith.constant 11 : index
      %c0_109 = arith.constant 0 : index
      %c0_110 = arith.constant 0 : index
      %205 = vector.load %arg2[%c11, %c0_109, %c0_110] : memref<13x8x256xf32, #tpu.memory_space<vmem>>, vector<1x8x256xf32>
      %206 = vector.shape_cast %205 : vector<1x8x256xf32> to vector<8x256xf32>
      %207 = arith.negf %206 : vector<8x256xf32>
      %208 = math.exp %207 : vector<8x256xf32>
      %cst_111 = arith.constant 1.000000e+00 : f32
      %209 = vector.broadcast %cst_111 : f32 to vector<8x256xf32>
      %210 = arith.addf %209, %208 : vector<8x256xf32>
      %211 = arith.divf %209, %210 : vector<8x256xf32>
      %212 = math.exp %211 : vector<8x256xf32>
      %213 = arith.addf %199, %212 : vector<8x256xf32>
      %cst_112 = arith.constant 6.000000e+00 : f32
      %214 = vector.broadcast %cst_112 : f32 to vector<8x256xf32>
      %215 = arith.cmpf oeq, %89, %214 : vector<8x256xf32>
      %cst_113 = arith.constant 0.000000e+00 : f32
      %216 = vector.broadcast %cst_113 : f32 to vector<8x256xf32>
      %217 = arith.select %215, %211, %216 : vector<8x256xi1>, vector<8x256xf32>
      %218 = arith.addf %204, %217 : vector<8x256xf32>
      %c12 = arith.constant 12 : index
      %c0_114 = arith.constant 0 : index
      %c0_115 = arith.constant 0 : index
      %219 = vector.load %arg2[%c12, %c0_114, %c0_115] : memref<13x8x256xf32, #tpu.memory_space<vmem>>, vector<1x8x256xf32>
      %220 = vector.shape_cast %219 : vector<1x8x256xf32> to vector<8x256xf32>
      %221 = arith.negf %220 : vector<8x256xf32>
      %222 = math.exp %221 : vector<8x256xf32>
      %cst_116 = arith.constant 1.000000e+00 : f32
      %223 = vector.broadcast %cst_116 : f32 to vector<8x256xf32>
      %224 = arith.addf %223, %222 : vector<8x256xf32>
      %225 = arith.divf %223, %224 : vector<8x256xf32>
      %226 = math.exp %225 : vector<8x256xf32>
      %227 = arith.addf %213, %226 : vector<8x256xf32>
      %cst_117 = arith.constant 7.000000e+00 : f32
      %228 = vector.broadcast %cst_117 : f32 to vector<8x256xf32>
      %229 = arith.cmpf oeq, %89, %228 : vector<8x256xf32>
      %cst_118 = arith.constant 0.000000e+00 : f32
      %230 = vector.broadcast %cst_118 : f32 to vector<8x256xf32>
      %231 = arith.select %229, %225, %230 : vector<8x256xi1>, vector<8x256xf32>
      %232 = arith.addf %218, %231 : vector<8x256xf32>
      %233 = math.log %227 : vector<8x256xf32>
      %234 = arith.subf %233, %232 : vector<8x256xf32>
      %235 = arith.mulf %1, %118 : vector<8x256xf32>
      %cst_119 = arith.constant dense<0.000000e+00> : vector<256xf32>
      %236 = vector.multi_reduction <add>, %235, %cst_119 [0] : vector<8x256xf32> to vector<256xf32>
      %237 = vector.shape_cast %236 : vector<256xf32> to vector<1x256xf32>
      %238 = vector.extract_strided_slice %237 {offsets = [0, 0], sizes = [1, 128], strides = [1, 1]} : vector<1x256xf32> to vector<1x128xf32>
      %239 = vector.extract_strided_slice %237 {offsets = [0, 128], sizes = [1, 128], strides = [1, 1]} : vector<1x256xf32> to vector<1x128xf32>
      %240 = arith.addf %238, %239 : vector<1x128xf32>
      %241 = arith.mulf %1, %24 : vector<8x256xf32>
      %cst_120 = arith.constant dense<0.000000e+00> : vector<256xf32>
      %242 = vector.multi_reduction <add>, %241, %cst_120 [0] : vector<8x256xf32> to vector<256xf32>
      %243 = vector.shape_cast %242 : vector<256xf32> to vector<1x256xf32>
      %244 = vector.extract_strided_slice %243 {offsets = [0, 0], sizes = [1, 128], strides = [1, 1]} : vector<1x256xf32> to vector<1x128xf32>
      %245 = vector.extract_strided_slice %243 {offsets = [0, 128], sizes = [1, 128], strides = [1, 1]} : vector<1x256xf32> to vector<1x128xf32>
      %246 = arith.addf %244, %245 : vector<1x128xf32>
      %247 = arith.mulf %1, %234 : vector<8x256xf32>
      %cst_121 = arith.constant dense<0.000000e+00> : vector<256xf32>
      %248 = vector.multi_reduction <add>, %247, %cst_121 [0] : vector<8x256xf32> to vector<256xf32>
      %249 = vector.shape_cast %248 : vector<256xf32> to vector<1x256xf32>
      %250 = vector.extract_strided_slice %249 {offsets = [0, 0], sizes = [1, 128], strides = [1, 1]} : vector<1x256xf32> to vector<1x128xf32>
      %251 = vector.extract_strided_slice %249 {offsets = [0, 128], sizes = [1, 128], strides = [1, 1]} : vector<1x256xf32> to vector<1x128xf32>
      %252 = arith.addf %250, %251 : vector<1x128xf32>
      scf.yield %240, %246, %252 : vector<1x128xf32>, vector<1x128xf32>, vector<1x128xf32>
    } else {
      %cst_45 = arith.constant 0.000000e+00 : f32
      %80 = vector.broadcast %cst_45 : f32 to vector<1x128xf32>
      scf.yield %80, %80, %80 : vector<1x128xf32>, vector<1x128xf32>, vector<1x128xf32>
    }
    %cst_13 = arith.constant 0.000000e+00 : f32
    %33 = vector.broadcast %cst_13 : f32 to vector<128xf32>
    %cst_14 = arith.constant dense<0.000000e+00> : vector<256xf32>
    %34 = vector.multi_reduction <add>, %1, %cst_14 [0] : vector<8x256xf32> to vector<256xf32>
    %35 = vector.shape_cast %34 : vector<256xf32> to vector<1x256xf32>
    %36 = vector.extract_strided_slice %35 {offsets = [0, 0], sizes = [1, 128], strides = [1, 1]} : vector<1x256xf32> to vector<1x128xf32>
    %37 = vector.extract_strided_slice %35 {offsets = [0, 128], sizes = [1, 128], strides = [1, 1]} : vector<1x256xf32> to vector<1x128xf32>
    %38 = arith.addf %36, %37 : vector<1x128xf32>
    %39 = vector.shape_cast %38 : vector<1x128xf32> to vector<128xf32>
    %c0_15 = arith.constant 0 : index
    %c0_16 = arith.constant 0 : index
    %c0_17 = arith.constant 0 : index
    %c0_18 = arith.constant 0 : index
    %40 = vector.load %arg4[%c0_15, %c0_16, %c0_17, %c0_18] : memref<1x1x8x128xf32, #tpu.memory_space<vmem>>, vector<1x1x1x128xf32>
    %41 = vector.shape_cast %40 : vector<1x1x1x128xf32> to vector<128xf32>
    %42 = vector.shape_cast %39 : vector<128xf32> to vector<1x1x1x128xf32>
    tpu.vector_store %arg4[%c0_15, %c0_16, %c0_17, %c0_18], %42 {strides = array<i32>} : memref<1x1x8x128xf32, #tpu.memory_space<vmem>>, vector<1x1x1x128xf32>,
    %cst_19 = arith.constant dense<0.000000e+00> : vector<256xf32>
    %43 = vector.multi_reduction <add>, %10, %cst_19 [0] : vector<8x256xf32> to vector<256xf32>
    %44 = vector.shape_cast %43 : vector<256xf32> to vector<1x256xf32>
    %45 = vector.extract_strided_slice %44 {offsets = [0, 0], sizes = [1, 128], strides = [1, 1]} : vector<1x256xf32> to vector<1x128xf32>
    %46 = vector.extract_strided_slice %44 {offsets = [0, 128], sizes = [1, 128], strides = [1, 1]} : vector<1x256xf32> to vector<1x128xf32>
    %47 = arith.addf %45, %46 : vector<1x128xf32>
    %48 = vector.shape_cast %47 : vector<1x128xf32> to vector<128xf32>
    %c0_20 = arith.constant 0 : index
    %c0_21 = arith.constant 0 : index
    %c1_22 = arith.constant 1 : index
    %c0_23 = arith.constant 0 : index
    %49 = vector.load %arg4[%c0_20, %c0_21, %c1_22, %c0_23] : memref<1x1x8x128xf32, #tpu.memory_space<vmem>>, vector<1x1x1x128xf32>
    %50 = vector.shape_cast %49 : vector<1x1x1x128xf32> to vector<128xf32>
    %51 = vector.shape_cast %48 : vector<128xf32> to vector<1x1x1x128xf32>
    tpu.vector_store %arg4[%c0_20, %c0_21, %c1_22, %c0_23], %51 {strides = array<i32>} : memref<1x1x8x128xf32, #tpu.memory_space<vmem>>, vector<1x1x1x128xf32>,
    %52 = vector.shape_cast %32#0 : vector<1x128xf32> to vector<128xf32>
    %c0_24 = arith.constant 0 : index
    %c0_25 = arith.constant 0 : index
    %c2 = arith.constant 2 : index
    %c0_26 = arith.constant 0 : index
    %53 = vector.load %arg4[%c0_24, %c0_25, %c2, %c0_26] : memref<1x1x8x128xf32, #tpu.memory_space<vmem>>, vector<1x1x1x128xf32>
    %54 = vector.shape_cast %53 : vector<1x1x1x128xf32> to vector<128xf32>
    %55 = vector.shape_cast %52 : vector<128xf32> to vector<1x1x1x128xf32>
    tpu.vector_store %arg4[%c0_24, %c0_25, %c2, %c0_26], %55 {strides = array<i32>} : memref<1x1x8x128xf32, #tpu.memory_space<vmem>>, vector<1x1x1x128xf32>,
    %56 = arith.mulf %10, %24 : vector<8x256xf32>
    %cst_27 = arith.constant dense<0.000000e+00> : vector<256xf32>
    %57 = vector.multi_reduction <add>, %56, %cst_27 [0] : vector<8x256xf32> to vector<256xf32>
    %58 = vector.shape_cast %57 : vector<256xf32> to vector<1x256xf32>
    %59 = vector.extract_strided_slice %58 {offsets = [0, 0], sizes = [1, 128], strides = [1, 1]} : vector<1x256xf32> to vector<1x128xf32>
    %60 = vector.extract_strided_slice %58 {offsets = [0, 128], sizes = [1, 128], strides = [1, 1]} : vector<1x256xf32> to vector<1x128xf32>
    %61 = arith.addf %59, %60 : vector<1x128xf32>
    %62 = vector.shape_cast %61 : vector<1x128xf32> to vector<128xf32>
    %c0_28 = arith.constant 0 : index
    %c0_29 = arith.constant 0 : index
    %c3 = arith.constant 3 : index
    %c0_30 = arith.constant 0 : index
    %63 = vector.load %arg4[%c0_28, %c0_29, %c3, %c0_30] : memref<1x1x8x128xf32, #tpu.memory_space<vmem>>, vector<1x1x1x128xf32>
    %64 = vector.shape_cast %63 : vector<1x1x1x128xf32> to vector<128xf32>
    %65 = vector.shape_cast %62 : vector<128xf32> to vector<1x1x1x128xf32>
    tpu.vector_store %arg4[%c0_28, %c0_29, %c3, %c0_30], %65 {strides = array<i32>} : memref<1x1x8x128xf32, #tpu.memory_space<vmem>>, vector<1x1x1x128xf32>,
    %66 = vector.shape_cast %32#1 : vector<1x128xf32> to vector<128xf32>
    %c0_31 = arith.constant 0 : index
    %c0_32 = arith.constant 0 : index
    %c4_33 = arith.constant 4 : index
    %c0_34 = arith.constant 0 : index
    %67 = vector.load %arg4[%c0_31, %c0_32, %c4_33, %c0_34] : memref<1x1x8x128xf32, #tpu.memory_space<vmem>>, vector<1x1x1x128xf32>
    %68 = vector.shape_cast %67 : vector<1x1x1x128xf32> to vector<128xf32>
    %69 = vector.shape_cast %66 : vector<128xf32> to vector<1x1x1x128xf32>
    tpu.vector_store %arg4[%c0_31, %c0_32, %c4_33, %c0_34], %69 {strides = array<i32>} : memref<1x1x8x128xf32, #tpu.memory_space<vmem>>, vector<1x1x1x128xf32>,
    %70 = vector.shape_cast %32#2 : vector<1x128xf32> to vector<128xf32>
    %c0_35 = arith.constant 0 : index
    %c0_36 = arith.constant 0 : index
    %c5 = arith.constant 5 : index
    %c0_37 = arith.constant 0 : index
    %71 = vector.load %arg4[%c0_35, %c0_36, %c5, %c0_37] : memref<1x1x8x128xf32, #tpu.memory_space<vmem>>, vector<1x1x1x128xf32>
    %72 = vector.shape_cast %71 : vector<1x1x1x128xf32> to vector<128xf32>
    %73 = vector.shape_cast %70 : vector<128xf32> to vector<1x1x1x128xf32>
    tpu.vector_store %arg4[%c0_35, %c0_36, %c5, %c0_37], %73 {strides = array<i32>} : memref<1x1x8x128xf32, #tpu.memory_space<vmem>>, vector<1x1x1x128xf32>,
    %c0_38 = arith.constant 0 : index
    %c0_39 = arith.constant 0 : index
    %c6_40 = arith.constant 6 : index
    %c0_41 = arith.constant 0 : index
    %74 = vector.load %arg4[%c0_38, %c0_39, %c6_40, %c0_41] : memref<1x1x8x128xf32, #tpu.memory_space<vmem>>, vector<1x1x1x128xf32>
    %75 = vector.shape_cast %74 : vector<1x1x1x128xf32> to vector<128xf32>
    %76 = vector.shape_cast %33 : vector<128xf32> to vector<1x1x1x128xf32>
    tpu.vector_store %arg4[%c0_38, %c0_39, %c6_40, %c0_41], %76 {strides = array<i32>} : memref<1x1x8x128xf32, #tpu.memory_space<vmem>>, vector<1x1x1x128xf32>,
    %c0_42 = arith.constant 0 : index
    %c0_43 = arith.constant 0 : index
    %c7 = arith.constant 7 : index
    %c0_44 = arith.constant 0 : index
    %77 = vector.load %arg4[%c0_42, %c0_43, %c7, %c0_44] : memref<1x1x8x128xf32, #tpu.memory_space<vmem>>, vector<1x1x1x128xf32>
    %78 = vector.shape_cast %77 : vector<1x1x1x128xf32> to vector<128xf32>
    %79 = vector.shape_cast %33 : vector<128xf32> to vector<1x1x1x128xf32>
    tpu.vector_store %arg4[%c0_42, %c0_43, %c7, %c0_44], %79 {strides = array<i32>} : memref<1x1x8x128xf32, #tpu.memory_space<vmem>>, vector<1x1x1x128xf32>,
    return
  }
  func.func @transform_0(%arg0: i32, %arg1: i32) -> (i32, i32, i32) {
    %c0_i32 = arith.constant 0 : i32
    %c0_i32_0 = arith.constant 0 : i32
    return %c0_i32, %arg0, %arg1 : i32, i32, i32
  }
  func.func @transform_1(%arg0: i32, %arg1: i32) -> (i32, i32, i32) {
    %c0_i32 = arith.constant 0 : i32
    %c0_i32_0 = arith.constant 0 : i32
    return %c0_i32, %arg0, %arg1 : i32, i32, i32
  }
  func.func @transform_2(%arg0: i32, %arg1: i32) -> (i32, i32, i32, i32) {
    %c0_i32 = arith.constant 0 : i32
    %c0_i32_0 = arith.constant 0 : i32
    %c0_i32_1 = arith.constant 0 : i32
    return %arg0, %arg1, %c0_i32, %c0_i32_0 : i32, i32, i32, i32
  }
}

</mosaic_0001>

<bundles_post_ra>
// kernel: region_loss_forward.1
= control target key start
LH: loop header
LB: loop body
LE: loop exit
PB: predicated region body
PF: predicated region fallthrough
CT: control target
= control target key end

     0   :  { %s1490_s9 = smov 0   ;;  %s1492_s10 = smov 0   ;;  %s2397_s0 = inlined_call_operand.vmem [shape: f32[13,16,256], index: 0, kind: input, shape index: {}]   ;;  %s2398_s1 = inlined_call_operand.vmem [shape: f32[8,16,256], index: 1, kind: input, shape index: {}]   ;;  %s2399_s2 = inlined_call_operand.vmem [shape: f32[2,1,8,128], index: 2, kind: output, shape index: {}]  }
   0x1   :  { %s1494_s11 = smov 0   ;;  %s1496_s12 = smov 0  }
   0x2   :  { %s1498_s13 = smov 0  }
   0x3 LB: > { %s24_s14 = sadd.s32 1, %s1456_s12  ;;  %p40_p1 = scmp.ne.s32.totalorder %s1448_s10, %s1444_s9  ;;  %s1460_s13 = sphi %s1498_s13, %s12_s13   ;;  %s1456_s12 = sphi %s1496_s12, %s2474_s12   ;;  %s1452_s11 = sphi %s1494_s11, %s2473_s11   ;;  %s1448_s10 = sphi %s1492_s10, %s2472_s10   ;;  %s1444_s9 = sphi %s1490_s9, %s2471_s9  }
   0x4   : > { %p26_p0 = scmp.ge.s32.totalorder %s24_s14, 2  ;;  %p41_p2 = scmp.eq.s32.totalorder %s1460_s13, 0 }
   0x5   : > { %s33_s17 = sadd.s32 1, %s1448_s10  ;;  %p1128_p5 = scmp.ge.s32.totalorder %s1460_s13, 2 }
   0x6   : > { %s2476_s14 = smov (%p26_p0, %s24_s14), 0  ;;  %p1521_p3 = por %p41_p2, %p40_p1 }
   0x7   : > { %s28_s16 = ssub.s32 %s1456_s12, %s2476_s14  ;;  %122 = sbr.rel (%p1128_p5) target bundleno = 62 (0x3e), region = 16 }
   0x8   : > { %p31_p4 = scmp.eq.s32.totalorder %s28_s16, 0 }
   0xa   : > { %s1529_s18 = scalar_select %p31_p4, %s1448_s10, %s33_s17  }
   0xc   : > { %125 = sbr.rel (!%p1521_p3) target bundleno = 42 (0x2a), region = 20  ;;  %s127_s19 = sand.u32 (%p1521_p3), 1, %s1448_s10  }
   0xd   : > { %s1199_s20 = sshll.u32 (%p1521_p3), %s1456_s12, 4  ;;  %s1201_s21 = smul.u32 (%p1521_p3), 208, %s127_s19 }
   0xe   : > { %s1539_s24 = scalar_lea.vmem (%p1521_p3), %s2397_s0, %s1199_s20 }
   0xf   : > { %v147_v0 = vld [vmem:[%s1539_s24] sm:$0xff] (%p1521_p3)  ;;  %v149_v1 = vld [vmem:[%s1539_s24 + $0x8] sm:$0xff] (%p1521_p3)  ;;  %s1544_s25 = scalar_lea.vmem (%p1521_p3), [#allocation2], %s1201_s21 }
  0x10   : > { %v151_v2 = vld [vmem:[%s1539_s24 + $0x20] sm:$0xff] (%p1521_p3)  ;;  %148 = vst [vmem:[%s1544_s25] sm:$0xff] (%p1521_p3), %v147_v0  ;;  %v153_v3 = vld [vmem:[%s1539_s24 + $0x28] sm:$0xff] (%p1521_p3) }
  0x11   : > { %150 = vst [vmem:[%s1544_s25 + $0x8] sm:$0xff] %v149_v1  ;;  %v155_v4 = vld [vmem:[%s1539_s24 + $0x40] sm:$0xff]  ;;  %v157_v5 = vld [vmem:[%s1539_s24 + $0x48] sm:$0xff] }
  0x12   : > { %152 = vst [vmem:[%s1544_s25 + $0x10] sm:$0xff] %v151_v2  ;;  %v159_v6 = vld [vmem:[%s1539_s24 + $0x60] sm:$0xff]  ;;  %v161_v7 = vld [vmem:[%s1539_s24 + $0x68] sm:$0xff] }
  0x13   : > { %154 = vst [vmem:[%s1544_s25 + $0x18] sm:$0xff] %v153_v3  ;;  %v163_v8 = vld [vmem:[%s1539_s24 + $0x80] sm:$0xff]  ;;  %v165_v9 = vld [vmem:[%s1539_s24 + $0x88] sm:$0xff] }
  0x14   : > { %156 = vst [vmem:[%s1544_s25 + $0x20] sm:$0xff] %v155_v4  ;;  %v167_v10 = vld [vmem:[%s1539_s24 + $0xa0] sm:$0xff]  ;;  %v169_v11 = vld [vmem:[%s1539_s24 + $0xa8] sm:$0xff] }
  0x15   : > { %158 = vst [vmem:[%s1544_s25 + $0x28] sm:$0xff] %v157_v5  ;;  %v171_v12 = vld [vmem:[%s1539_s24 + $0xc0] sm:$0xff]  ;;  %v173_v13 = vld [vmem:[%s1539_s24 + $0xc8] sm:$0xff] }
  0x16   : > { %160 = vst [vmem:[%s1544_s25 + $0x30] sm:$0xff] %v159_v6  ;;  %v175_v14 = vld [vmem:[%s1539_s24 + $0xe0] sm:$0xff]  ;;  %v177_v15 = vld [vmem:[%s1539_s24 + $0xe8] sm:$0xff] }
  0x17   : > { %162 = vst [vmem:[%s1544_s25 + $0x38] sm:$0xff] %v161_v7  ;;  %v179_v16 = vld [vmem:[%s1539_s24 + $0x100] sm:$0xff]  ;;  %v181_v17 = vld [vmem:[%s1539_s24 + $0x108] sm:$0xff] }
  0x18   : > { %164 = vst [vmem:[%s1544_s25 + $0x40] sm:$0xff] %v163_v8  ;;  %v183_v18 = vld [vmem:[%s1539_s24 + $0x120] sm:$0xff]  ;;  %v185_v19 = vld [vmem:[%s1539_s24 + $0x128] sm:$0xff] }
  0x19   : > { %166 = vst [vmem:[%s1544_s25 + $0x48] sm:$0xff] %v165_v9  ;;  %v187_v20 = vld [vmem:[%s1539_s24 + $0x140] sm:$0xff]  ;;  %v189_v21 = vld [vmem:[%s1539_s24 + $0x148] sm:$0xff] }
  0x1a   : > { %168 = vst [vmem:[%s1544_s25 + $0x50] sm:$0xff] %v167_v10  ;;  %v191_v22 = vld [vmem:[%s1539_s24 + $0x160] sm:$0xff]  ;;  %v193_v23 = vld [vmem:[%s1539_s24 + $0x168] sm:$0xff] }
  0x1b   : > { %170 = vst [vmem:[%s1544_s25 + $0x58] sm:$0xff] %v169_v11  ;;  %v195_v24 = vld [vmem:[%s1539_s24 + $0x180] sm:$0xff]  ;;  %v197_v25 = vld [vmem:[%s1539_s24 + $0x188] sm:$0xff] }
  0x1c   : > { %172 = vst [vmem:[%s1544_s25 + $0x60] sm:$0xff] %v171_v12 }
  0x1d   : > { %174 = vst [vmem:[%s1544_s25 + $0x68] sm:$0xff] %v173_v13 }
  0x1e   : > { %176 = vst [vmem:[%s1544_s25 + $0x70] sm:$0xff] %v175_v14 }
  0x1f   : > { %178 = vst [vmem:[%s1544_s25 + $0x78] sm:$0xff] %v177_v15 }
  0x20   : > { %180 = vst [vmem:[%s1544_s25 + $0x80] sm:$0xff] %v179_v16 }
  0x21   : > { %182 = vst [vmem:[%s1544_s25 + $0x88] sm:$0xff] %v181_v17 }
  0x22   : > { %184 = vst [vmem:[%s1544_s25 + $0x90] sm:$0xff] %v183_v18 }
  0x23   : > { %186 = vst [vmem:[%s1544_s25 + $0x98] sm:$0xff] %v185_v19 }
  0x24   : > { %188 = vst [vmem:[%s1544_s25 + $0xa0] sm:$0xff] %v187_v20 }
  0x25   : > { %190 = vst [vmem:[%s1544_s25 + $0xa8] sm:$0xff] %v189_v21 }
  0x26   : > { %192 = vst [vmem:[%s1544_s25 + $0xb0] sm:$0xff] %v191_v22 }
  0x27   : > { %194 = vst [vmem:[%s1544_s25 + $0xb8] sm:$0xff] %v193_v23 }
  0x28   : > { %196 = vst [vmem:[%s1544_s25 + $0xc0] sm:$0xff] %v195_v24 }
  0x29   : > { %198 = vst [vmem:[%s1544_s25 + $0xc8] sm:$0xff] %v197_v25 }
  0x2a PF: > { %204 = sbr.rel (!%p1521_p3) target bundleno = 62 (0x3e), region = 43  ;;  %s206_s26 = sand.u32 (%p1521_p3), 1, %s1448_s10  }
  0x2b   : > { %s1200_s27 = sshll.u32 (%p1521_p3), %s1456_s12, 4  ;;  %s1131_s28 = sshll.u32 (%p1521_p3), %s206_s26, 7 }
  0x2c   : > { %s1602_s3 = scalar_lea.vmem (%p1521_p3), %s2398_s1, %s1200_s27  ;;  %s208_s4 = scalar_lea.vmem (%p1521_p3), [#allocation3], %s1131_s28 }
  0x2d   : > { %v226_v26 = vld [vmem:[%s1602_s3] sm:$0xff] (%p1521_p3)  ;;  %v228_v27 = vld [vmem:[%s1602_s3 + $0x8] sm:$0xff] (%p1521_p3) }
  0x2e   : > { %v230_v28 = vld [vmem:[%s1602_s3 + $0x20] sm:$0xff] (%p1521_p3)  ;;  %227 = vst [vmem:[%s208_s4] sm:$0xff] (%p1521_p3), %v226_v26  ;;  %v232_v29 = vld [vmem:[%s1602_s3 + $0x28] sm:$0xff] (%p1521_p3) }
  0x2f   : > { %229 = vst [vmem:[%s208_s4 + $0x8] sm:$0xff] %v228_v27  ;;  %v234_v30 = vld [vmem:[%s1602_s3 + $0x40] sm:$0xff]  ;;  %v236_v31 = vld [vmem:[%s1602_s3 + $0x48] sm:$0xff] }
  0x30   : > { %231 = vst [vmem:[%s208_s4 + $0x10] sm:$0xff] %v230_v28  ;;  %v238_v32 = vld [vmem:[%s1602_s3 + $0x60] sm:$0xff]  ;;  %v240_v33 = vld [vmem:[%s1602_s3 + $0x68] sm:$0xff] }
  0x31   : > { %233 = vst [vmem:[%s208_s4 + $0x18] sm:$0xff] %v232_v29  ;;  %v242_v34 = vld [vmem:[%s1602_s3 + $0x80] sm:$0xff]  ;;  %v244_v35 = vld [vmem:[%s1602_s3 + $0x88] sm:$0xff] }
  0x32   : > { %235 = vst [vmem:[%s208_s4 + $0x20] sm:$0xff] %v234_v30  ;;  %v246_v36 = vld [vmem:[%s1602_s3 + $0xa0] sm:$0xff]  ;;  %v248_v37 = vld [vmem:[%s1602_s3 + $0xa8] sm:$0xff] }
  0x33   : > { %237 = vst [vmem:[%s208_s4 + $0x28] sm:$0xff] %v236_v31  ;;  %v250_v38 = vld [vmem:[%s1602_s3 + $0xc0] sm:$0xff]  ;;  %v252_v39 = vld [vmem:[%s1602_s3 + $0xc8] sm:$0xff] }
  0x34   : > { %239 = vst [vmem:[%s208_s4 + $0x30] sm:$0xff] %v238_v32  ;;  %v254_v40 = vld [vmem:[%s1602_s3 + $0xe0] sm:$0xff]  ;;  %v256_v41 = vld [vmem:[%s1602_s3 + $0xe8] sm:$0xff] }
  0x35   : > { %241 = vst [vmem:[%s208_s4 + $0x38] sm:$0xff] %v240_v33 }
  0x36   : > { %243 = vst [vmem:[%s208_s4 + $0x40] sm:$0xff] %v242_v34 }
  0x37   : > { %245 = vst [vmem:[%s208_s4 + $0x48] sm:$0xff] %v244_v35 }
  0x38   : > { %247 = vst [vmem:[%s208_s4 + $0x50] sm:$0xff] %v246_v36 }
  0x39   : > { %249 = vst [vmem:[%s208_s4 + $0x58] sm:$0xff] %v248_v37 }
  0x3a   : > { %251 = vst [vmem:[%s208_s4 + $0x60] sm:$0xff] %v250_v38 }
  0x3b   : > { %253 = vst [vmem:[%s208_s4 + $0x68] sm:$0xff] %v252_v39 }
  0x3c   : > { %255 = vst [vmem:[%s208_s4 + $0x70] sm:$0xff] %v254_v40 }
  0x3d   : > { %257 = vst [vmem:[%s208_s4 + $0x78] sm:$0xff] %v256_v41 }
  0x3e PF: > { %p1134_p6 = scmp.ge.s32.totalorder %s1460_s13, 1  ;;  %p262_p7 = scmp.lt.s32.totalorder %s1460_s13, 3 }
  0x40   : > { %p263_p8 = pnand %p1134_p6, %p262_p7 }
  0x41   : > { %s269_s5 = sand.u32 (!%p263_p8), 1, %s1444_s9   ;;  %p305_p9 = scmp.lt.s32.totalorder (!%p263_p8), %s1452_s11, 1 }
  0x42   : > { %266 = sbr.rel (%p263_p8) target bundleno = 419 (0x1a3), region = 66  ;;  %s1135_s7 = sshll.u32 (!%p263_p8), %s269_s5, 7 }
  0x43   : > { %s1202_s6 = smul.u32 (!%p263_p8), 208, %s269_s5  ;;  %s1624_s8 = scalar_lea.vmem (!%p263_p8), [#allocation3], %s1135_s7 }
  0x45   : > { %s1641_s9 = scalar_lea.vmem (!%p263_p8), [#allocation2], %s1202_s6 }
  0x47   : > { %v1627_v42 = vld [vmem:[%s1624_s8] sm:$0xff]  ;;  %v1630_v43 = vld [vmem:[%s1624_s8 + $0x8] sm:$0xff]  ;;  %v1137_v44 = vld [vmem:[%s1624_s8 + $0x10] sm:$0xff]  ;;  %s2478_s11 = smov (!%p305_p9, %s1452_s11), 1  ;;  %v1474_v56 = vmov 0.0   ;;  %v1663_v21 = vmov 0  }
  0x48   : > { %v1138_v45 = vld [vmem:[%s1624_s8 + $0x18] sm:$0xff]  ;;  %v1139_v46 = vld [vmem:[%s1624_s8 + $0x60] sm:$0xff]  ;;  %v1140_v47 = vld [vmem:[%s1624_s8 + $0x68] sm:$0xff]  ;;  %v320_v48 = vsub.f32 %v1137_v44, %v1627_v42  ;;  %v353_v49 = vadd.f32 %v1630_v43, %v1627_v42  ;;  %s1136_s15 = sshll.u32 %s2478_s11, 3  ;;  %v1665_v22 = vmov 0   ;;  %v1667_v23 = vmov 0  }
  0x49   : > { %v321_v50 = vsub.f32 %v1138_v45, %v1630_v43  ;;  %v1143_v51 = vld [vmem:[%s1641_s9 + $0x40] sm:$0xff]  ;;  %v1144_v52 = vld [vmem:[%s1641_s9 + $0x48] sm:$0xff]  ;;  %s1648_s19 = scalar_lea.vmem %s2399_s2, %s1136_s15 }
  0x4a   : > { %vm322_vm0 = vcmp.ne.f32.partialorder %v320_v48, 0.0  ;;  %v331_v53 = vmax.f32 %v1143_v51, 0.0  ;;  %v332_v54 = vmax.f32 %v1144_v52, 0.0  ;;  %v333_v55 = vmul.f32 %v1143_v51, %v1139_v46  ;;  %354 = vadd.xlane.f32.xlu0 %v353_v49 }
  0x4b   : > { %vm323_vm1 = vcmp.ne.f32.partialorder %v321_v50, 0.0  ;;  %v1651_v57 = vsel %vm322_vm0, 1.0, %v1474_v56  ;;  %v334_v58 = vmul.f32 %v1144_v52, %v1140_v47  ;;  %v337_v59 = vand.u32 2147483647, %v1143_v51 }
  0x4c   : > { %v1654_v60 = vsel %vm323_vm1, 1.0, %v1474_v56  ;;  %v335_v61 = vsub.f32 %v331_v53, %v333_v55  ;;  %v338_v62 = vand.u32 2147483647, %v1144_v52 }
  0x4d   : > { %v336_v63 = vsub.f32 %v332_v54, %v334_v58  ;;  %v339_v0 = vsub.f32 0.0, %v337_v59 }
  0x4e   : > { %v340_v1 = vsub.f32 0.0, %v338_v62 }
  0x4f   : > { %v341_v2 = vmul.f32 1.442695, %v339_v0 }
  0x50   : > { %v343_v3 = vmul.f32 1.442695, %v340_v1 }
  0x51   : > { %1286 = vpow2.f32 %v341_v2 }
  0x52   : > { %1288 = vpow2.f32 %v343_v3 }
  0x57   : > { %v1287_v4 = vpop.eup %1286 }
  0x58   : > { %v1289_v5 = vpop.eup %1288  ;;  %v345_v6 = vadd.f32 1.0, %v1287_v4 }
  0x59   : > { %v346_v7 = vadd.f32 1.0, %v1289_v5 }
  0x5a   : > { %1290 = vlog2.f32 %v345_v6 }
  0x5b   : > { %1292 = vlog2.f32 %v346_v7 }
  0x60   : > { %v1291_v8 = vpop.eup %1290 }
  0x61   : > { %v1293_v9 = vpop.eup %1292  ;;  %v348_v10 = vmul.f32 0.6931472, %v1291_v8 }
  0x62   : > { %v350_v11 = vmul.f32 0.6931472, %v1293_v9 }
  0x63   : > { %v1656_v12 = vadd.f32 %v348_v10, %v335_v61 }
  0x64   : > { %v1658_v13 = vadd.f32 %v350_v11, %v336_v63 }
  0xbd   : > { %v355_v14 = vpop.xlane.xlu0 %354 }
  0xbe   : > { %v356_v15 = vrot.slane %v355_v14, 4 }
  0xc0   : > { %v357_v16 = vadd.f32 %v356_v15, %v355_v14 }
  0xc2   : > { %v358_v17 = vrot.slane %v357_v16, 2 }
  0xc4   : > { %v359_v18 = vadd.f32 %v358_v17, %v357_v16 }
  0xc6   : > { %v360_v19 = vrot.slane %v359_v18, 1 }
  0xc8   : > { %v361_v20 = vadd.f32 %v360_v19, %v359_v18 }
  0xca   : > { %1203 = vpush %v361_v20 }
  0xfb   : > { %s1660_s11 = spop %1203 }
  0xfc   : > { %p363_p10 = scmp.gt.f32.partialorder %s1660_s11, 0.0 }
  0xfd   : > { %v382_v24 = vld [vmem:[%s1641_s9] sm:$0xff] (%p363_p10)  ;;  %v383_v25 = vld [vmem:[%s1641_s9 + $0x8] sm:$0xff] (%p363_p10)  ;;  %v1157_v28 = vld [vmem:[%s1641_s9 + $0x10] sm:$0xff] (%p363_p10) }
  0xfe   : > { %366 = sbr.rel (!%p363_p10) target bundleno = 401 (0x191), region = 78  ;;  %v1155_v26 = vmul.f32 (%p363_p10), -1.442695, %v382_v24  ;;  %v1156_v27 = vmul.f32 (%p363_p10), -1.442695, %v383_v25  ;;  %v1158_v29 = vld [vmem:[%s1641_s9 + $0x18] sm:$0xff] (%p363_p10) }
  0xff   : > { %v1159_v30 = vmul.f32 (%p363_p10), -1.442695, %v1157_v28  ;;  %v1160_v31 = vmul.f32 (%p363_p10), -1.442695, %v1158_v29  ;;  %v1165_v32 = vld [vmem:[%s1641_s9 + $0x50] sm:$0xff] (%p363_p10)  ;;  %v1166_v33 = vld [vmem:[%s1641_s9 + $0x58] sm:$0xff] (%p363_p10) }
 0x100   : > { %1294 = vpow2.f32 (%p363_p10), %v1155_v26  ;;  %v1167_v34 = vmul.f32 (%p363_p10), -1.442695, %v1165_v32  ;;  %v1168_v35 = vmul.f32 (%p363_p10), -1.442695, %v1166_v33  ;;  %v1169_v36 = vld [vmem:[%s1641_s9 + $0x60] sm:$0xff] (%p363_p10)  ;;  %v1150_v52 = vld [vmem:[%s1624_s8 + $0x48] sm:$0xff] (%p363_p10) }
 0x101   : > { %1296 = vpow2.f32 (%p363_p10), %v1156_v27  ;;  %v1171_v44 = vmul.f32 (%p363_p10), -1.442695, %v1169_v36  ;;  %v1149_v48 = vld [vmem:[%s1624_s8 + $0x40] sm:$0xff] (%p363_p10)  ;;  %v1162_v53 = vld [vmem:[%s1641_s9 + $0x28] sm:$0xff] (%p363_p10)  ;;  %v1151_v55 = vld [vmem:[%s1624_s8 + $0x50] sm:$0xff] (%p363_p10) }
 0x102   : > { %1298 = vpow2.f32 (%p363_p10), %v1159_v30  ;;  %v1161_v51 = vld [vmem:[%s1641_s9 + $0x20] sm:$0xff] (%p363_p10)  ;;  %v1163_v58 = vld [vmem:[%s1641_s9 + $0x30] sm:$0xff] (%p363_p10)  ;;  %v1170_v59 = vld [vmem:[%s1641_s9 + $0x68] sm:$0xff] (%p363_p10)  ;;  %v480_v1 = vsub.f32 (%p363_p10), %v1162_v53, %v1150_v52 }
 0x103   : > { %1300 = vpow2.f32 %v1160_v31  ;;  %v479_v61 = vsub.f32 %v1161_v51, %v1149_v48  ;;  %v1173_v63 = vld [vmem:[%s1641_s9 + $0x70] sm:$0xff]  ;;  %v1152_v3 = vld [vmem:[%s1624_s8 + $0x58] sm:$0xff]  ;;  %v485_v6 = vsub.f32 %v1163_v58, %v1151_v55  ;;  %v1172_v7 = vmul.f32 -1.442695, %v1170_v59 }
 0x104   : > { %1302 = vpow2.f32 %v1167_v34  ;;  %v1164_v5 = vld [vmem:[%s1641_s9 + $0x38] sm:$0xff]  ;;  %v1175_v10 = vmul.f32 -1.442695, %v1173_v63  ;;  %v1720_v18 = vmul.f32 %v480_v1, %v480_v1 }
 0x105   : > { %1304 = vpow2.f32 %v1168_v35  ;;  %v1174_v8 = vld [vmem:[%s1641_s9 + $0x78] sm:$0xff]  ;;  %v1714_v15 = vmul.f32 %v479_v61, %v479_v61  ;;  %v1722_v19 = vsub.f32 %v1164_v5, %v1152_v3  ;;  %v1729_v24 = vmul.f32 %v485_v6, %v485_v6 }
 0x106   : > { %v1295_v37 = vpop.eup %1294  ;;  %v1176_v20 = vmul.f32 -1.442695, %v1174_v8 }
 0x107   : > { %v1297_v38 = vpop.eup %1296  ;;  %v1678_v39 = vadd.f32 1.0, %v1295_v37 }
 0x108   : > { %v1299_v40 = vpop.eup %1298  ;;  %v1680_v41 = vadd.f32 1.0, %v1297_v38 }
 0x109   : > { %v1301_v45 = vpop.eup %1300  ;;  %1306 = vrcp.f32 %v1678_v39  ;;  %v1685_v49 = vadd.f32 1.0, %v1299_v40  ;;  %v401_v17 = vand.u32 2147483647, %v1678_v39  ;;  %v403_v22 = vand.u32 2147483648, %v1678_v39 }
 0x10a   : > { %v1303_v46 = vpop.eup %1302  ;;  %1308 = vrcp.f32 %v1680_v41  ;;  %v1687_v50 = vadd.f32 1.0, %v1301_v45  ;;  %vm397_vm2 = vweird.f32 %v1678_v39  ;;  %vm412_vm3 = vweird.f32 %v1680_v41 }
 0x10b   : > { %v1305_v47 = vpop.eup %1304  ;;  %v1692_v54 = vadd.f32 1.0, %v1303_v46  ;;  %1310 = vpow2.f32 %v1171_v44  ;;  %vm1740_vm4 = vcmp.eq.f32.partialorder %v401_v17, 8.507059e+37  ;;  %v416_v32 = vand.u32 2147483647, %v1680_v41  ;;  %v1145_v17 = vld [vmem:[%s1624_s8 + $0x20] sm:$0xff] }
 0x10c   : > { %1312 = vrcp.f32 %v1685_v49  ;;  %v1699_v62 = vadd.f32 1.0, %v1305_v47  ;;  %v418_v33 = vand.u32 2147483648, %v1680_v41  ;;  %v404_v36 = vor.u32 1.1754944e-38, %v403_v22  ;;  %v1822_v22 = vld [vmem:[%s1624_s8 + $0x70] sm:$0xff] }
 0x10d   : > { %1314 = vrcp.f32 %v1687_v50  ;;  %vm438_vm6 = vweird.f32 %v1685_v49  ;;  %v442_v44 = vand.u32 2147483647, %v1685_v49  ;;  %v444_v47 = vand.u32 2147483648, %v1685_v49 }
 0x10e   : > { %1316 = vrcp.f32 %v1692_v54  ;;  %vm453_vm10 = vweird.f32 %v1687_v50  ;;  %v459_v59 = vand.u32 2147483648, %v1687_v50  ;;  %vm1781_vm13 = vcmp.eq.f32.partialorder %v416_v32, 8.507059e+37 }
 0x10f   : > { %v1702_v0 = vpop.eup %1306  ;;  %1318 = vrcp.f32 %v1699_v62  ;;  %v419_v1 = vor.u32 1.1754944e-38, %v418_v33  ;;  %v445_v6 = vor.u32 1.1754944e-38, %v444_v47  ;;  %vm1801_vm15 = vcmp.eq.f32.partialorder %v442_v44, 8.507059e+37 }
 0x110   : > { %v1705_v2 = vpop.eup %1308  ;;  %v393_v4 = vmul.f32 %v1702_v0, %v1678_v39  ;;  %1320 = vpow2.f32 %v1172_v7  ;;  %vm398_vm5 = vweird.f32 %v1702_v0  ;;  %v457_v39 = vand.u32 2147483647, %v1687_v50 }
 0x111   : > { %v408_v9 = vmul.f32 %v1705_v2, %v1680_v41  ;;  %v1311_v11 = vpop.eup %1310  ;;  %1322 = vpow2.f32 %v1175_v10  ;;  %vm1763_vm8 = vmor %vm397_vm2, %vm398_vm5  ;;  %vm413_vm9 = vweird.f32 %v1705_v2  ;;  %vm507_vm2 = vweird.f32 %v1692_v54  ;;  %v1178_v41 = vld [vmem:[%s1641_s9 + $0x88] sm:$0xff] }
 0x112   : > { %v394_v14 = vsub.f32 1.0, %v393_v4  ;;  %v1717_v16 = vpop.eup %1312  ;;  %v1750_v38 = vadd.f32 1.0, %v1311_v11  ;;  %vm1792_vm14 = vmor %vm412_vm3, %vm413_vm9  ;;  %vm1813_vm1 = vcmp.eq.f32.partialorder %v457_v39, 8.507059e+37  ;;  %v511_v31 = vand.u32 2147483647, %v1692_v54 }
 0x113   : > { %v1724_v21 = vpop.eup %1314  ;;  %v434_v23 = vmul.f32 %v1717_v16, %v1685_v49  ;;  %v409_v26 = vsub.f32 1.0, %v408_v9  ;;  %vm439_vm7 = vweird.f32 %v1717_v16  ;;  %vm522_vm5 = vweird.f32 %v1699_v62 }
 0x114   : > { %v1731_v25 = vpop.eup %1316  ;;  %v449_v27 = vmul.f32 %v1724_v21, %v1687_v50  ;;  %v395_v28 = vmul.f32 %v1702_v0, %v394_v14  ;;  %vm1772_vm11 = vmor %vm438_vm6, %vm439_vm7  ;;  %vm454_vm12 = vweird.f32 %v1724_v21  ;;  %1324 = vrcp.f32 %v1750_v38 }
 0x115   : > { %v435_v29 = vsub.f32 1.0, %v434_v23  ;;  %v503_v30 = vmul.f32 %v1731_v25, %v1692_v54  ;;  %v1746_v35 = vpop.eup %1318  ;;  %v410_v40 = vmul.f32 %v1705_v2, %v409_v26  ;;  %vm1809_vm0 = vmor %vm453_vm10, %vm454_vm12  ;;  %1326 = vpow2.f32 %v1176_v20 }
 0x116   : > { %v450_v34 = vsub.f32 1.0, %v449_v27  ;;  %v1321_v45 = vpop.eup %1320  ;;  %v396_v46 = vadd.f32 %v1702_v0, %v395_v28  ;;  %v518_v49 = vmul.f32 %v1746_v35, %v1699_v62  ;;  %v460_v14 = vor.u32 1.1754944e-38, %v459_v59  ;;  %v1147_v27 = vld [vmem:[%s1624_s8 + $0x30] sm:$0xff] }
 0x117   : > { %v436_v37 = vmul.f32 %v1717_v16, %v435_v29  ;;  %v504_v51 = vsub.f32 1.0, %v503_v30  ;;  %v1759_v52 = vpop.eup %1322  ;;  %v411_v61 = vadd.f32 %v1705_v2, %v410_v40  ;;  %v1785_v3 = vadd.f32 1.0, %v1321_v45  ;;  %v1148_v40 = vld [vmem:[%s1624_s8 + $0x38] sm:$0xff] }
 0x118   : > { %v451_v48 = vmul.f32 %v1724_v21, %v450_v34  ;;  %v400_v4 = vsel %vm1763_vm8, %v1702_v0, %v396_v46  ;;  %v519_v0 = vsub.f32 1.0, %v518_v49  ;;  %vm508_vm3 = vweird.f32 %v1731_v25 }
 0x119   : > { %v437_v55 = vadd.f32 %v1717_v16, %v436_v37  ;;  %v505_v8 = vmul.f32 %v1731_v25, %v504_v51  ;;  %v405_v50 = vsel %vm1740_vm4, %v404_v36, %v400_v4  ;;  %v415_v20 = vsel %vm1792_vm14, %v1705_v2, %v411_v61  ;;  %vm1849_vm4 = vmor %vm507_vm2, %vm508_vm3  ;;  %v1146_v36 = vld [vmem:[%s1624_s8 + $0x28] sm:$0xff] }
 0x11a   : > { %v452_v7 = vadd.f32 %v1724_v21, %v451_v48  ;;  %v513_v23 = vand.u32 2147483648, %v1692_v54  ;;  %1328 = vrcp.f32 %v1785_v3  ;;  %v1831_v26 = vpop.eup %1324  ;;  %v1843_v2 = vmul.f32 %v1722_v19, %v1722_v19 }
 0x11b   : > { %v441_v9 = vsel %vm1772_vm11, %v1717_v16, %v437_v55  ;;  %v1177_v16 = vld [vmem:[%s1641_s9 + $0x80] sm:$0xff]  ;;  %v506_v30 = vadd.f32 %v1731_v25, %v505_v8  ;;  %v520_v33 = vmul.f32 %v1746_v35, %v519_v0  ;;  %v420_v19 = vsel %vm1781_vm13, %v419_v1, %v415_v20  ;;  %v1327_v54 = vpop.eup %1326  ;;  %v1872_v55 = vld [vmem:[%s1624_s8 + $0x78] sm:$0xff] }
 0x11c   : > { %v446_v28 = vsel %vm1801_vm15, %v445_v6, %v441_v9  ;;  %v456_v29 = vsel %vm1809_vm0, %v1724_v21, %v452_v7  ;;  %v556_v21 = vmul.f32 %v1831_v26, %v1750_v38  ;;  %v1179_v34 = vmul.f32 -1.442695, %v1177_v16  ;;  %v1182_v20 = vld [vmem:[%s1641_s9 + $0x98] sm:$0xff] }
 0x11d   : > { %v469_v37 = vsub.f32 %v405_v50, %v1145_v17  ;;  %vm538_vm6 = vcmp.eq.f32.partialorder %v1822_v22, 0.0  ;;  %v461_v44 = vsel %vm1813_vm1, %v460_v14, %v456_v29  ;;  %v473_v45 = vsub.f32 %v446_v28, %v1147_v27  ;;  %v1181_v14 = vld [vmem:[%s1641_s9 + $0x90] sm:$0xff] }
 0x11e   : > { %v514_v46 = vor.u32 1.1754944e-38, %v513_v23  ;;  %vm523_vm7 = vweird.f32 %v1746_v35  ;;  %v510_v47 = vsel %vm1849_vm4, %v1731_v25, %v506_v30  ;;  %vm512_vm8 = vcmp.eq.f32.partialorder %v511_v31, 8.507059e+37 }
 0x11f   : > { %v528_v48 = vand.u32 2147483648, %v1699_v62  ;;  %v557_v51 = vsub.f32 1.0, %v556_v21  ;;  %v470_v49 = vsub.f32 %v420_v19, %v1146_v36  ;;  %v521_v58 = vadd.f32 %v1746_v35, %v520_v33  ;;  %vm1881_vm9 = vmor %vm522_vm5, %vm523_vm7 }
 0x120   : > { %v1869_v53 = vpop.eup %1328  ;;  %v526_v39 = vand.u32 2147483647, %v1699_v62  ;;  %v1877_v59 = vadd.f32 1.0, %v1759_v52  ;;  %v471_v61 = vmul.f32 %v469_v37, %v469_v37  ;;  %v474_v63 = vsub.f32 %v461_v44, %v1148_v40 }
 0x121   : > { %v571_v1 = vmul.f32 %v1869_v53, %v1785_v3  ;;  %v1887_v4 = vadd.f32 1.0, %v1327_v54  ;;  %v475_v5 = vmul.f32 %v473_v45, %v473_v45  ;;  %v515_v6 = vsel %vm512_vm8, %v514_v46, %v510_v47 }
 0x122   : > { %v564_v52 = vand.u32 2147483647, %v1750_v38  ;;  %1330 = vrcp.f32 %v1877_v59  ;;  %v529_v7 = vor.u32 1.1754944e-38, %v528_v48  ;;  %vm539_vm10 = vcmp.eq.f32.partialorder %v1872_v55, 0.0 }
 0x123   : > { %v558_v62 = vmul.f32 %v1831_v26, %v557_v51  ;;  %1332 = vrcp.f32 %v1887_v4  ;;  %v525_v8 = vsel %vm1881_vm9, %v1746_v35, %v521_v58  ;;  %vm527_vm11 = vcmp.eq.f32.partialorder %v526_v39, 8.507059e+37  ;;  %v1185_v51 = vld [vmem:[%s1641_s9 + $0xa0] sm:$0xff] }
 0x124   : > { %v566_v9 = vand.u32 2147483648, %v1750_v38  ;;  %v572_v10 = vsub.f32 1.0, %v571_v1  ;;  %v472_v0 = vmul.f32 %v470_v49, %v470_v49  ;;  %v532_v11 = vmul.f32 1.442695, %v515_v6 }
 0x125   : > { %vm560_vm12 = vweird.f32 %v1750_v38  ;;  %vm561_vm13 = vweird.f32 %v1831_v26  ;;  %v476_v16 = vmul.f32 %v474_v63, %v474_v63  ;;  %v477_v17 = vadd.f32 %v475_v5, %v471_v61 }
 0x126   : > { %v1904_v50 = vsel %vm538_vm6, %v515_v6, 0.0  ;;  %vm1906_vm14 = vcmp.eq.f32.partialorder %v564_v52, 8.507059e+37  ;;  %v530_v23 = vsel %vm527_vm11, %v529_v7, %v525_v8  ;;  %v559_v27 = vadd.f32 %v1831_v26, %v558_v62  ;;  %vm1914_vm15 = vmor %vm560_vm12, %vm561_vm13  ;;  %v1186_v6 = vld [vmem:[%s1641_s9 + $0xa8] sm:$0xff] }
 0x127   : > { %1334 = vpow2.f32 %v1179_v34  ;;  %v1180_v28 = vmul.f32 -1.442695, %v1178_v41  ;;  %v567_v30 = vor.u32 1.1754944e-38, %v566_v9  ;;  %v573_v31 = vmul.f32 %v1869_v53, %v572_v10 }
 0x128   : > { %v1912_v38 = vpop.eup %1330  ;;  %vm575_vm0 = vweird.f32 %v1785_v3  ;;  %v1183_v32 = vmul.f32 -1.442695, %v1181_v14  ;;  %v579_v21 = vand.u32 2147483647, %v1785_v3  ;;  %v1184_v36 = vmul.f32 -1.442695, %v1182_v20 }
 0x129   : > { %v1920_v33 = vpop.eup %1332  ;;  %v609_v34 = vmul.f32 %v1912_v38, %v1877_v59  ;;  %1336 = vpow2.f32 %v1180_v28  ;;  %vm576_vm1 = vweird.f32 %v1869_v53  ;;  %v581_v19 = vand.u32 2147483648, %v1785_v3 }
 0x12a   : > { %v624_v37 = vmul.f32 %v1920_v33, %v1887_v4  ;;  %1338 = vpow2.f32 %v1183_v32  ;;  %v478_v54 = vadd.f32 %v476_v16, %v472_v0  ;;  %v563_v40 = vsel %vm1914_vm15, %v1831_v26, %v559_v27  ;;  %vm1943_vm2 = vmor %vm575_vm0, %vm576_vm1 }
 0x12b   : > { %1340 = vpow2.f32 %v532_v11  ;;  %v610_v44 = vsub.f32 1.0, %v609_v34  ;;  %v1933_v45 = vadd.f32 %v1714_v15, %v477_v17  ;;  %v534_v46 = vmul.f32 1.442695, %v530_v23 }
 0x12c   : > { %v1937_v47 = vsel %vm539_vm10, %v530_v23, 0.0  ;;  %v574_v48 = vadd.f32 %v1869_v53, %v573_v31  ;;  %vm1947_vm3 = vcmp.eq.f32.partialorder %v579_v21, 8.507059e+37  ;;  %vm591_vm4 = vcmp.eq.f32.partialorder %v1822_v22, 1.0 }
 0x12d   : > { %v1335_v49 = vpop.eup %1334  ;;  %v625_v15 = vsub.f32 1.0, %v624_v37  ;;  %1342 = vpow2.f32 %v1184_v36  ;;  %v568_v39 = vsel %vm1906_vm14, %v567_v30, %v563_v40  ;;  %v582_v61 = vor.u32 1.1754944e-38, %v581_v19 }
 0x12e   : > { %v611_v63 = vmul.f32 %v1912_v38, %v610_v44  ;;  %v1955_v25 = vadd.f32 1.0, %v1335_v49  ;;  %vm613_vm5 = vweird.f32 %v1877_v59  ;;  %v617_v1 = vand.u32 2147483647, %v1877_v59  ;;  %v1190_v44 = vld [vmem:[%s1641_s9 + $0xb8] sm:$0xff] }
 0x12f   : > { %v1337_v3 = vpop.eup %1336  ;;  %v619_v5 = vand.u32 2147483648, %v1877_v59  ;;  %v1187_v52 = vmul.f32 -1.442695, %v1185_v51  ;;  %v578_v62 = vsel %vm1943_vm2, %v1869_v53, %v574_v48  ;;  %vm614_vm6 = vweird.f32 %v1912_v38 }
 0x130   : > { %v1339_v7 = vpop.eup %1338  ;;  %v1965_v8 = vadd.f32 1.0, %v1337_v3  ;;  %1344 = vrcp.f32 %v1955_v25  ;;  %v585_v10 = vmul.f32 1.442695, %v568_v39  ;;  %v626_v41 = vmul.f32 %v1920_v33, %v625_v15  ;;  %vm1980_vm8 = vmor %vm613_vm5, %vm614_vm6 }
 0x131   : > { %v1968_v9 = vpop.eup %1340  ;;  %vm628_vm7 = vweird.f32 %v1887_v4  ;;  %v632_v0 = vand.u32 2147483647, %v1887_v4  ;;  %v612_v11 = vadd.f32 %v1912_v38, %v611_v63  ;;  %v634_v14 = vand.u32 2147483648, %v1887_v4 }
 0x132   : > { %1346 = vrcp.f32 %v1965_v8  ;;  %v1188_v53 = vmul.f32 -1.442695, %v1186_v6  ;;  %v583_v17 = vsel %vm1947_vm3, %v582_v61, %v578_v62  ;;  %vm629_vm9 = vweird.f32 %v1920_v33 }
 0x133   : > { %v1343_v16 = vpop.eup %1342  ;;  %v1985_v20 = vadd.f32 1.0, %v1339_v7  ;;  %1348 = vpow2.f32 %v1187_v52  ;;  %v1988_v23 = vadd.f32 %v1720_v18, %v478_v54  ;;  %vm592_vm10 = vcmp.eq.f32.partialorder %v1872_v55, 1.0  ;;  %vm2007_vm12 = vmor %vm628_vm7, %vm629_vm9 }
 0x134   : > { %1350 = vpow2.f32 %v534_v46  ;;  %vm1991_vm11 = vcmp.eq.f32.partialorder %v617_v1, 8.507059e+37  ;;  %v1997_v59 = vsel %vm591_vm4, %v568_v39, 0.0  ;;  %v620_v28 = vor.u32 1.1754944e-38, %v619_v5 }
 0x135   : > { %1352 = vpow2.f32 %v585_v10  ;;  %v627_v29 = vadd.f32 %v1920_v33, %v626_v41  ;;  %v587_v18 = vmul.f32 1.442695, %v583_v17  ;;  %v616_v31 = vsel %vm1980_vm8, %v1912_v38, %v612_v11  ;;  %v1189_v38 = vld [vmem:[%s1641_s9 + $0xb0] sm:$0xff]  ;;  %v1193_v10 = vld [vmem:[%s1641_s9 + $0xc0] sm:$0xff] }
 0x136   : > { %v2000_v30 = vpop.eup %1344  ;;  %v2011_v21 = vadd.f32 1.0, %v1343_v16  ;;  %1354 = vpow2.f32 %v1188_v53  ;;  %vm2013_vm13 = vcmp.eq.f32.partialorder %v632_v0, 8.507059e+37  ;;  %v635_v36 = vor.u32 1.1754944e-38, %v634_v14 }
 0x137   : > { %v662_v19 = vmul.f32 %v2000_v30, %v1955_v25  ;;  %1356 = vrcp.f32 %v1985_v20  ;;  %v2025_v4 = vsel %vm592_vm10, %v583_v17, 0.0  ;;  %v670_v54 = vand.u32 2147483647, %v1955_v25 }
 0x138   : > { %v2021_v37 = vpop.eup %1346  ;;  %v672_v40 = vand.u32 2147483648, %v1955_v25  ;;  %1358 = vrcp.f32 %v2011_v21  ;;  %v2033_v48 = vsel %vm1991_vm11, %v620_v28, %v616_v31  ;;  %v631_v51 = vsel %vm2007_vm12, %v1920_v33, %v627_v29 }
 0x139   : > { %v1349_v46 = vpop.eup %1348  ;;  %v663_v49 = vsub.f32 1.0, %v662_v19  ;;  %v677_v58 = vmul.f32 %v2021_v37, %v1965_v8  ;;  %1360 = vpow2.f32 %v587_v18  ;;  %vm666_vm14 = vweird.f32 %v1955_v25 }
 0x13a   : > { %v2040_v26 = vpop.eup %1350  ;;  %vm667_vm15 = vweird.f32 %v2000_v30  ;;  %v2044_v15 = vmul.f32 -1.442695, %v1189_v38  ;;  %vm681_vm0 = vweird.f32 %v1965_v8  ;;  %v2050_v33 = vmul.f32 -1.442695, %v1190_v44 }
 0x13b   : > { %v2046_v39 = vpop.eup %1352  ;;  %v664_v61 = vmul.f32 %v2000_v30, %v663_v49  ;;  %v678_v63 = vsub.f32 1.0, %v677_v58  ;;  %v2054_v1 = vsel %vm2013_vm13, %v635_v36, %v631_v51  ;;  %v638_v5 = vmul.f32 1.442695, %v2033_v48  ;;  %vm2066_vm2 = vmor %vm666_vm14, %vm667_vm15 }
 0x13c   : > { %v1355_v3 = vpop.eup %1354  ;;  %vm2057_vm1 = vcmp.eq.f32.partialorder %v670_v54, 8.507059e+37  ;;  %v2061_v52 = vadd.f32 1.0, %v1349_v46  ;;  %v673_v41 = vor.u32 1.1754944e-38, %v672_v40  ;;  %v685_v11 = vand.u32 2147483647, %v1965_v8 }
 0x13d   : > { %v1357_v7 = vpop.eup %1356  ;;  %v665_v62 = vadd.f32 %v2000_v30, %v664_v61  ;;  %v679_v0 = vmul.f32 %v2021_v37, %v678_v63  ;;  %vm682_vm3 = vweird.f32 %v2021_v37  ;;  %v687_v53 = vand.u32 2147483648, %v1965_v8 }
 0x13e   : > { %v2072_v14 = vpop.eup %1358  ;;  %v715_v16 = vmul.f32 %v1357_v7, %v1985_v20  ;;  %1362 = vrcp.f32 %v2061_v52  ;;  %vm719_vm4 = vweird.f32 %v1985_v20  ;;  %v723_v25 = vand.u32 2147483647, %v1985_v20  ;;  %vm2093_vm6 = vmor %vm681_vm0, %vm682_vm3 }
 0x13f   : > { %v730_v17 = vmul.f32 %v2072_v14, %v2011_v21  ;;  %v2082_v35 = vadd.f32 1.0, %v1355_v3  ;;  %v2084_v27 = vpop.eup %1360  ;;  %v669_v28 = vsel %vm2066_vm2, %v2000_v30, %v665_v62  ;;  %v680_v29 = vadd.f32 %v2021_v37, %v679_v0 }
 0x140   : > { %v716_v18 = vsub.f32 1.0, %v715_v16  ;;  %vm720_vm5 = vweird.f32 %v1357_v7  ;;  %v640_v31 = vmul.f32 1.442695, %v2054_v1  ;;  %vm2097_vm7 = vcmp.eq.f32.partialorder %v685_v11, 8.507059e+37 }
 0x141   : > { %v725_v36 = vand.u32 2147483648, %v1985_v20  ;;  %v731_v19 = vsub.f32 1.0, %v730_v17  ;;  %vm734_vm8 = vweird.f32 %v2011_v21  ;;  %vm735_vm9 = vweird.f32 %v2072_v14  ;;  %vm2111_vm10 = vmor %vm719_vm4, %vm720_vm5 }
 0x142   : > { %v717_v30 = vmul.f32 %v1357_v7, %v716_v18  ;;  %v740_v38 = vand.u32 2147483648, %v2011_v21  ;;  %v2107_v8 = vsel %vm2057_vm1, %v673_v41, %v669_v28  ;;  %v688_v54 = vor.u32 1.1754944e-38, %v687_v53  ;;  %vm2128_vm12 = vmor %vm734_vm8, %vm735_vm9 }
 0x143   : > { %vm2115_vm11 = vcmp.eq.f32.partialorder %v723_v25, 8.507059e+37  ;;  %v732_v46 = vmul.f32 %v2072_v14, %v731_v19  ;;  %v684_v49 = vsel %vm2093_vm6, %v2021_v37, %v680_v29  ;;  %v738_v61 = vand.u32 2147483647, %v2011_v21  ;;  %v1194_v29 = vld [vmem:[%s1641_s9 + $0xc8] sm:$0xff] }
 0x144   : > { %v1363_v51 = vpop.eup %1362  ;;  %v718_v58 = vadd.f32 %v1357_v7, %v717_v30  ;;  %1364 = vrcp.f32 %v2082_v35  ;;  %v726_v20 = vor.u32 1.1754944e-38, %v725_v36  ;;  %v776_v62 = vand.u32 2147483647, %v2061_v52 }
 0x145   : > { %v733_v63 = vadd.f32 %v2072_v14, %v732_v46  ;;  %v768_v6 = vmul.f32 %v1363_v51, %v2061_v52  ;;  %v691_v37 = vmul.f32 1.442695, %v2107_v8  ;;  %v741_v0 = vor.u32 1.1754944e-38, %v740_v38 }
 0x146   : > { %v722_v41 = vsel %vm2111_vm10, %v1357_v7, %v718_v58  ;;  %v778_v11 = vand.u32 2147483648, %v2061_v52  ;;  %vm644_vm13 = vcmp.eq.f32.partialorder %v1822_v22, 2.0  ;;  %v2142_v21 = vsel %vm2097_vm7, %v688_v54, %v684_v49 }
 0x147   : > { %v769_v53 = vsub.f32 1.0, %v768_v6  ;;  %vm772_vm14 = vweird.f32 %v2061_v52  ;;  %vm773_vm15 = vweird.f32 %v1363_v51  ;;  %1366 = vpow2.f32 %v638_v5 }
 0x148   : > { %v737_v16 = vsel %vm2128_vm12, %v2072_v14, %v733_v63  ;;  %vm739_vm0 = vcmp.eq.f32.partialorder %v738_v61, 8.507059e+37  ;;  %v1195_v7 = vmul.f32 -1.442695, %v1193_v10  ;;  %1368 = vpow2.f32 %v640_v31  ;;  %vm2158_vm2 = vmor %vm772_vm14, %vm773_vm15 }
 0x149   : > { %v2150_v25 = vsel %vm2115_vm11, %v726_v20, %v722_v41  ;;  %v770_v17 = vmul.f32 %v1363_v51, %v769_v53  ;;  %vm2152_vm1 = vcmp.eq.f32.partialorder %v776_v62, 8.507059e+37  ;;  %1370 = vpow2.f32 %v691_v37 }
 0x14a   : > { %v1365_v52 = vpop.eup %1364  ;;  %v693_v5 = vmul.f32 1.442695, %v2142_v21  ;;  %v779_v14 = vor.u32 1.1754944e-38, %v778_v11  ;;  %vm787_vm3 = vweird.f32 %v2082_v35  ;;  %v2163_v31 = vsel %vm739_vm0, %v741_v0, %v737_v16 }
 0x14b   : > { %v771_v32 = vadd.f32 %v1363_v51, %v770_v17  ;;  %v783_v34 = vmul.f32 %v1365_v52, %v2082_v35  ;;  %v791_v36 = vand.u32 2147483647, %v2082_v35  ;;  %v744_v19 = vmul.f32 1.442695, %v2150_v25 }
 0x14c   : > { %v793_v30 = vand.u32 2147483648, %v2082_v35  ;;  %1372 = vpow2.f32 %v2044_v15  ;;  %v1196_v38 = vmul.f32 -1.442695, %v1194_v29  ;;  %vm788_vm4 = vweird.f32 %v1365_v52 }
 0x14d   : > { %v775_v54 = vsel %vm2158_vm2, %v1363_v51, %v771_v32  ;;  %v784_v40 = vsub.f32 1.0, %v783_v34  ;;  %1374 = vpow2.f32 %v2050_v33  ;;  %v1367_v44 = vpop.eup %1366  ;;  %v589_v46 = vadd.f32 %v2046_v39, %v1968_v9  ;;  %vm2190_vm6 = vmor %vm787_vm3, %vm788_vm4 }
 0x14e   : > { %vm645_vm5 = vcmp.eq.f32.partialorder %v1872_v55, 2.0  ;;  %1376 = vpow2.f32 %v693_v5  ;;  %v746_v49 = vmul.f32 1.442695, %v2163_v31  ;;  %v1369_v58 = vpop.eup %1368  ;;  %v590_v15 = vadd.f32 %v2084_v27, %v2040_v26 }
 0x14f   : > { %v595_v51 = vadd.f32 %v1997_v59, %v1904_v50  ;;  %v785_v61 = vmul.f32 %v1365_v52, %v784_v40  ;;  %1378 = vpow2.f32 %v1195_v7  ;;  %v1371_v20 = vpop.eup %1370  ;;  %v596_v33 = vadd.f32 %v2025_v4, %v1937_v47 }
 0x150   : > { %v2185_v9 = vsel %vm2152_vm1, %v779_v14, %v775_v54  ;;  %v794_v26 = vor.u32 1.1754944e-38, %v793_v30  ;;  %1380 = vpow2.f32 %v1196_v38  ;;  %vm697_vm7 = vcmp.eq.f32.partialorder %v1822_v22, 3.0 }
 0x151   : > { %1382 = vpow2.f32 %v744_v19  ;;  %v786_v50 = vadd.f32 %v1365_v52, %v785_v61  ;;  %vm792_vm8 = vcmp.eq.f32.partialorder %v791_v36, 8.507059e+37  ;;  %v642_v47 = vadd.f32 %v1367_v44, %v589_v46 }
 0x152   : > { %v1373_v59 = vpop.eup %1372  ;;  %v646_v4 = vsel %vm644_vm13, %v2033_v48, 0.0  ;;  %v647_v35 = vsel %vm645_vm5, %v2054_v1, 0.0  ;;  %1384 = vpow2.f32 %v746_v49  ;;  %v643_v63 = vadd.f32 %v1369_v58, %v590_v15 }
 0x153   : > { %v1375_v27 = vpop.eup %1374  ;;  %v790_v3 = vsel %vm2190_vm6, %v1365_v52, %v786_v50  ;;  %v797_v6 = vmul.f32 1.442695, %v2185_v9  ;;  %v2204_v62 = vadd.f32 1.0, %v1373_v59  ;;  %v489_v37 = vadd.f32 %v1729_v24, %v1933_v45 }
 0x154   : > { %v1377_v10 = vpop.eup %1376  ;;  %vm698_vm9 = vcmp.eq.f32.partialorder %v1872_v55, 3.0  ;;  %v2209_v48 = vsel %vm792_vm8, %v794_v26, %v790_v3  ;;  %v2211_v41 = vadd.f32 1.0, %v1375_v27  ;;  %v490_v0 = vadd.f32 %v1843_v2, %v1988_v23 }
 0x155   : > { %v1379_v1 = vpop.eup %1378  ;;  %v648_v11 = vadd.f32 %v646_v4, %v595_v51  ;;  %v799_v53 = vmul.f32 1.442695, %v2209_v48  ;;  %1386 = vrcp.f32 %v2204_v62  ;;  %v649_v7 = vadd.f32 %v647_v35, %v596_v33 }
 0x156   : > { %v1381_v16 = vpop.eup %1380  ;;  %v695_v17 = vadd.f32 %v1371_v20, %v642_v47  ;;  %v699_v24 = vsel %vm697_vm7, %v2107_v8, 0.0  ;;  %1388 = vrcp.f32 %v2211_v41  ;;  %v696_v28 = vadd.f32 %v1377_v10, %v643_v63 }
 0x157   : > { %v1383_v45 = vpop.eup %1382  ;;  %v700_v29 = vsel %vm698_vm9, %v2142_v21, 0.0  ;;  %vm750_vm10 = vcmp.eq.f32.partialorder %v1822_v22, 4.0  ;;  %1390 = vpow2.f32 %v797_v6  ;;  %v829_v23 = vand.u32 2147483647, %v2204_v62 }
 0x158   : > { %v1385_v2 = vpop.eup %1384  ;;  %v831_v52 = vand.u32 2147483648, %v2204_v62  ;;  %v844_v5 = vand.u32 2147483647, %v2211_v41  ;;  %v2226_v18 = vadd.f32 1.0, %v1379_v1  ;;  %v2228_v14 = vadd.f32 %v699_v24, %v648_v11 }
 0x159   : > { %1392 = vpow2.f32 %v799_v53  ;;  %v846_v8 = vand.u32 2147483648, %v2211_v41  ;;  %v2231_v32 = vadd.f32 1.0, %v1381_v16  ;;  %v2233_v21 = vadd.f32 %v700_v29, %v649_v7 }
 0x15a   : > { %v2235_v34 = vadd.f32 %v1383_v45, %v695_v17  ;;  %v2238_v36 = vsel %vm750_vm10, %v2150_v25, 0.0  ;;  %1394 = vrcp.f32 %v2226_v18  ;;  %v2241_v30 = vadd.f32 %v1385_v2, %v696_v28 }
 0x15b   : > { %v1387_v19 = vpop.eup %1386  ;;  %vm825_vm11 = vweird.f32 %v2204_v62  ;;  %vm840_vm12 = vweird.f32 %v2211_v41  ;;  %1396 = vrcp.f32 %v2231_v32  ;;  %vm2247_vm13 = vcmp.eq.f32.partialorder %v829_v23, 8.507059e+37 }
 0x15c   : > { %v1389_v38 = vpop.eup %1388  ;;  %v821_v54 = vmul.f32 %v1387_v19, %v2204_v62  ;;  %v832_v25 = vor.u32 1.1754944e-38, %v831_v52  ;;  %vm2251_vm14 = vcmp.eq.f32.partialorder %v844_v5, 8.507059e+37  ;;  %v847_v58 = vor.u32 1.1754944e-38, %v846_v8 }
 0x15d   : > { %v2255_v46 = vpop.eup %1390  ;;  %v836_v49 = vmul.f32 %v1389_v38, %v2211_v41  ;;  %vm878_vm15 = vweird.f32 %v2226_v18  ;;  %v884_v15 = vand.u32 2147483648, %v2226_v18  ;;  %vm826_vm0 = vweird.f32 %v1387_v19 }
 0x15e   : > { %v822_v51 = vsub.f32 1.0, %v821_v54  ;;  %v882_v61 = vand.u32 2147483647, %v2226_v18  ;;  %vm893_vm1 = vweird.f32 %v2231_v32  ;;  %vm841_vm2 = vweird.f32 %v1389_v38  ;;  %vm2274_vm4 = vmor %vm825_vm11, %vm826_vm0 }
 0x15f   : > { %v2262_v20 = vpop.eup %1392  ;;  %v837_v33 = vsub.f32 1.0, %v836_v49  ;;  %v897_v39 = vand.u32 2147483647, %v2231_v32  ;;  %v899_v26 = vand.u32 2147483648, %v2231_v32  ;;  %vm751_vm3 = vcmp.eq.f32.partialorder %v1872_v55, 4.0  ;;  %vm2282_vm6 = vmor %vm840_vm12, %vm841_vm2 }
 0x160   : > { %v1395_v50 = vpop.eup %1394  ;;  %v823_v59 = vmul.f32 %v1387_v19, %v822_v51  ;;  %v921_v47 = vmul.f32 %v489_v37, %v1627_v42  ;;  %v922_v4 = vmul.f32 %v490_v0, %v1630_v43  ;;  %v936_v35 = vmul.f32 %v1656_v12, %v1627_v42 }
 0x161   : > { %v1397_v27 = vpop.eup %1396  ;;  %v838_v3 = vmul.f32 %v1389_v38, %v837_v33  ;;  %v874_v6 = vmul.f32 %v1395_v50, %v2226_v18  ;;  %vm879_vm5 = vweird.f32 %v1395_v50  ;;  %v885_v10 = vor.u32 1.1754944e-38, %v884_v15 }
 0x162   : > { %v824_v1 = vadd.f32 %v1387_v19, %v823_v59  ;;  %v889_v0 = vmul.f32 %v1397_v27, %v2231_v32  ;;  %v923_v62 = vrot.slane %v921_v47, 4  ;;  %v937_v11 = vmul.f32 %v1658_v13, %v1630_v43  ;;  %vm2301_vm9 = vmor %vm878_vm15, %vm879_vm5 }
 0x163   : > { %v839_v53 = vadd.f32 %v1389_v38, %v838_v3  ;;  %v875_v16 = vsub.f32 1.0, %v874_v6  ;;  %vm894_vm7 = vweird.f32 %v1397_v27  ;;  %v929_v7 = vrot.slane %v922_v4, 4 }
 0x164   : > { %v828_v17 = vsel %vm2274_vm4, %v1387_v19, %v824_v1  ;;  %v890_v24 = vsub.f32 1.0, %v889_v0  ;;  %v924_v45 = vadd.f32 %v923_v62, %v921_v47  ;;  %v938_v41 = vrot.slane %v936_v35, 4  ;;  %vm2308_vm11 = vmor %vm893_vm1, %vm894_vm7 }
 0x165   : > { %vm803_vm8 = vcmp.eq.f32.partialorder %v1822_v22, 5.0  ;;  %v833_v28 = vsel %vm2247_vm13, %v832_v25, %v828_v17  ;;  %v843_v29 = vsel %vm2282_vm6, %v1389_v38, %v839_v53  ;;  %v876_v2 = vmul.f32 %v1395_v50, %v875_v16 }
 0x166   : > { %v930_v23 = vadd.f32 %v929_v7, %v922_v4  ;;  %v848_v52 = vsel %vm2251_vm14, %v847_v58, %v843_v29  ;;  %v850_v5 = vmul.f32 1.442695, %v833_v28  ;;  %v891_v19 = vmul.f32 %v1397_v27, %v890_v24 }
 0x167   : > { %v944_v54 = vrot.slane %v937_v11, 4  ;;  %v852_v40 = vmul.f32 1.442695, %v848_v52  ;;  %v877_v25 = vadd.f32 %v1395_v50, %v876_v2  ;;  %vm883_vm10 = vcmp.eq.f32.partialorder %v882_v61, 8.507059e+37 }
 0x168   : > { %v900_v44 = vor.u32 1.1754944e-38, %v899_v26  ;;  %1398 = vpow2.f32 %v850_v5  ;;  %v892_v49 = vadd.f32 %v1397_v27, %v891_v19  ;;  %vm898_vm12 = vcmp.eq.f32.partialorder %v897_v39, 8.507059e+37 }
 0x169   : > { %v925_v18 = vrot.slane %v924_v45, 2  ;;  %1400 = vpow2.f32 %v852_v40  ;;  %v881_v58 = vsel %vm2301_vm9, %v1395_v50, %v877_v25  ;;  %v931_v15 = vrot.slane %v930_v23, 2 }
 0x16a   : > { %v939_v51 = vadd.f32 %v938_v41, %v936_v35  ;;  %v886_v33 = vsel %vm883_vm10, %v885_v10, %v881_v58  ;;  %v896_v61 = vsel %vm2308_vm11, %v1397_v27, %v892_v49  ;;  %v945_v59 = vadd.f32 %v944_v54, %v937_v11 }
 0x16b   : > { %v926_v32 = vadd.f32 %v925_v18, %v924_v45  ;;  %v753_v26 = vsel %vm751_vm3, %v2163_v31, 0.0  ;;  %v901_v47 = vsel %vm898_vm12, %v900_v44, %v896_v61  ;;  %v903_v4 = vmul.f32 1.442695, %v886_v33 }
 0x16c   : > { %v932_v39 = vadd.f32 %v931_v15, %v930_v23  ;;  %v801_v63 = vadd.f32 %v2255_v46, %v2235_v34  ;;  %vm804_vm13 = vcmp.eq.f32.partialorder %v1872_v55, 5.0  ;;  %v905_v50 = vmul.f32 1.442695, %v901_v47 }
 0x16d   : > { %v927_v35 = vrot.slane %v926_v32, 1  ;;  %v802_v3 = vadd.f32 %v2262_v20, %v2241_v30  ;;  %1402 = vpow2.f32 %v903_v4  ;;  %v940_v6 = vrot.slane %v939_v51, 2 }
 0x16e   : > { %v933_v27 = vrot.slane %v932_v39, 1  ;;  %v1399_v10 = vpop.eup %1398  ;;  %1404 = vpow2.f32 %v905_v50  ;;  %v946_v31 = vrot.slane %v945_v59, 2  ;;  %v754_v0 = vadd.f32 %v2238_v36, %v2228_v14 }
 0x16f   : > { %v928_v1 = vadd.f32 %v927_v35, %v926_v32  ;;  %v1401_v37 = vpop.eup %1400  ;;  %v755_v34 = vadd.f32 %v753_v26, %v2233_v21  ;;  %v941_v62 = vadd.f32 %v940_v6, %v939_v51  ;;  %v805_v11 = vsel %vm803_vm8, %v2185_v9, 0.0 }
 0x170   : > { %v934_v46 = vadd.f32 %v933_v27, %v932_v39  ;;  %v806_v30 = vsel %vm804_vm13, %v2209_v48, 0.0  ;;  %v854_v20 = vadd.f32 %v1399_v10, %v801_v63  ;;  %v947_v53 = vadd.f32 %v946_v31, %v945_v59 }
 0x171   : > { %v855_v16 = vadd.f32 %v1401_v37, %v802_v3  ;;  %vm856_vm14 = vcmp.eq.f32.partialorder %v1822_v22, 6.0  ;;  %v942_v7 = vrot.slane %v941_v62, 1  ;;  %vm857_vm15 = vcmp.eq.f32.partialorder %v1872_v55, 6.0 }
 0x172   : > { %v935_v23 = vadd.f32 %v934_v46, %v928_v1   ;;  %v948_v14 = vrot.slane %v947_v53, 1  ;;  %v807_v36 = vadd.f32 %v805_v11, %v754_v0  ;;  %v808_v17 = vadd.f32 %v806_v30, %v755_v34 }
 0x173   : > { %v1403_v21 = vpop.eup %1402  ;;  %v943_v24 = vadd.f32 %v942_v7, %v941_v62  ;;  %v858_v9 = vsel %vm856_vm14, %v833_v28, 0.0  ;;  %v859_v2 = vsel %vm857_vm15, %v848_v52, 0.0  ;;  %vm909_vm0 = vcmp.eq.f32.partialorder %v1822_v22, 7.0 }
 0x174   : > { %v1405_v45 = vpop.eup %1404  ;;  %v907_v41 = vadd.f32 %v1403_v21, %v854_v20  ;;  %v949_v29 = vadd.f32 %v948_v14, %v947_v53  ;;  %vm910_vm1 = vcmp.eq.f32.partialorder %v1872_v55, 7.0  ;;  %v860_v5 = vadd.f32 %v858_v9, %v807_v36 }
 0x175   : > { %v908_v48 = vadd.f32 %v1405_v45, %v855_v16  ;;  %v861_v8 = vadd.f32 %v859_v2, %v808_v17  ;;  %v911_v19 = vsel %vm909_vm0, %v886_v33, 0.0  ;;  %v912_v54 = vsel %vm910_vm1, %v901_v47, 0.0 }
 0x176   : > { %1406 = vlog2.f32 %v907_v41  ;;  %v950_v22 = vadd.f32 %v949_v29, %v943_v24   ;;  %v913_v40 = vadd.f32 %v911_v19, %v860_v5 }
 0x177   : > { %1408 = vlog2.f32 %v908_v48  ;;  %v914_v38 = vadd.f32 %v912_v54, %v861_v8 }
 0x17c   : > { %v1407_v25 = vpop.eup %1406 }
 0x17d   : > { %v1409_v44 = vpop.eup %1408  ;;  %v916_v28 = vmul.f32 0.6931472, %v1407_v25 }
 0x17e   : > { %v918_v49 = vmul.f32 0.6931472, %v1409_v44 }
 0x17f   : > { %v919_v18 = vsub.f32 %v916_v28, %v913_v40 }
 0x180   : > { %v920_v52 = vsub.f32 %v918_v49, %v914_v38 }
 0x181   : > { %v951_v58 = vmul.f32 %v919_v18, %v1627_v42 }
 0x182   : > { %v952_v15 = vmul.f32 %v920_v52, %v1630_v43 }
 0x183   : > { %v953_v55 = vrot.slane %v951_v58, 4 }
 0x184   : > { %v959_v51 = vrot.slane %v952_v15, 4 }
 0x185   : > { %v954_v61 = vadd.f32 %v953_v55, %v951_v58 }
 0x186   : > { %v960_v32 = vadd.f32 %v959_v51, %v952_v15 }
 0x187   : > { %v955_v59 = vrot.slane %v954_v61, 2 }
 0x188   : > { %v961_v26 = vrot.slane %v960_v32, 2 }
 0x189   : > { %v956_v33 = vadd.f32 %v955_v59, %v954_v61 }
 0x18a   : > { %v962_v47 = vadd.f32 %v961_v26, %v960_v32 }
 0x18b   : > { %v957_v4 = vrot.slane %v956_v33, 1 }
 0x18c   : > { %v963_v39 = vrot.slane %v962_v47, 1 }
 0x18d   : > { %v958_v63 = vadd.f32 %v957_v4, %v956_v33 }
 0x18e   : > { %v964_v50 = vadd.f32 %v963_v39, %v962_v47 }
 0x190   : > { %v965_v21 = vadd.f32 %v964_v50, %v958_v63  }
 0x191 PF: > { %v975_v35 = vrot.slane %v1627_v42, 4  ;;  %v981_v3 = vrot.slane %v1630_v43, 4  ;;  %v989_v27 = vrot.slane %v1651_v57, 4  ;;  %v995_v6 = vrot.slane %v1654_v60, 4  ;;  %1022 = vst [vmem:[%s1648_s19 + $0x6] sm:$0x1] %v1474_v56  ;;  %v1472_v23 = vphi %v1667_v23, %v935_v23   ;;  %v1468_v22 = vphi %v1665_v22, %v950_v22   ;;  %v1464_v21 = vphi %v1663_v21, %v965_v21  }
 0x192   : > { %s1218_s20 = scalar_select %p363_p10, 0, 1  ;;  %v1004_v10 = vmul.f32 %v1651_v57, %v1656_v12  ;;  %v1005_v1 = vmul.f32 %v1654_v60, %v1658_v13  ;;  %1023 = vst [vmem:[%s1648_s19 + $0x7] sm:$0x1] %v1474_v56 }
 0x193   : > { %v976_v31 = vadd.f32 %v975_v35, %v1627_v42  ;;  %v982_v37 = vadd.f32 %v981_v3, %v1630_v43  ;;  %v990_v0 = vadd.f32 %v1651_v57, %v989_v27  ;;  %v996_v34 = vadd.f32 %v1654_v60, %v995_v6 }
 0x194   : > { %v1207_v46 = vstv %s1218_s20  ;;  %v1006_v62 = vrot.slane %v1004_v10, 4  ;;  %v1012_v11 = vrot.slane %v1005_v1, 4 }
 0x195   : > { %v977_v30 = vrot.slane %v976_v31, 2  ;;  %v983_v20 = vrot.slane %v982_v37, 2  ;;  %v991_v53 = vrot.slane %v990_v0, 2  ;;  %v997_v12 = vrot.slane %v996_v34, 2 }
 0x196   : > { %vm2366_vm2 = vcmp.ne.s32.totalorder %v1207_v46, 0  ;;  %v1007_v56 = vadd.f32 %v1006_v62, %v1004_v10  ;;  %v1013_v42 = vadd.f32 %v1012_v11, %v1005_v1 }
 0x197   : > { %v978_v43 = vadd.f32 %v977_v30, %v976_v31  ;;  %v984_v16 = vadd.f32 %v983_v20, %v982_v37  ;;  %v992_v57 = vadd.f32 %v991_v53, %v990_v0  ;;  %v998_v7 = vadd.f32 %v997_v12, %v996_v34 }
 0x198   : > { %v1209_v60 = vsel %vm2366_vm2, 0.0, %v1472_v23  ;;  %v1008_v14 = vrot.slane %v1007_v56, 2  ;;  %v1014_v36 = vrot.slane %v1013_v42, 2  ;;  %v1213_v17 = vsel %vm2366_vm2, 0.0, %v1468_v22 }
 0x199   : > { %v979_v24 = vrot.slane %v978_v43, 1  ;;  %v985_v45 = vrot.slane %v984_v16, 1  ;;  %v993_v9 = vrot.slane %v992_v57, 1  ;;  %v999_v41 = vrot.slane %v998_v7, 1  ;;  %1003 = vst [vmem:[%s1648_s19 + $0x2] sm:$0x1] %v1209_v60 }
 0x19a   : > { %v1009_v29 = vadd.f32 %v1008_v14, %v1007_v56  ;;  %v1015_v2 = vadd.f32 %v1014_v36, %v1013_v42  ;;  %1020 = vst [vmem:[%s1648_s19 + $0x4] sm:$0x1] %v1213_v17  ;;  %v1217_v23 = vsel %vm2366_vm2, 0.0, %v1464_v21 }
 0x19b   : > { %v980_v48 = vadd.f32 %v979_v24, %v978_v43  ;;  %v986_v5 = vadd.f32 %v985_v45, %v984_v16  ;;  %v994_v8 = vadd.f32 %v993_v9, %v992_v57  ;;  %v1000_v19 = vadd.f32 %v999_v41, %v998_v7  ;;  %1021 = vst [vmem:[%s1648_s19 + $0x5] sm:$0x1] %v1217_v23 }
 0x19c   : > { %v1010_v22 = vrot.slane %v1009_v29, 1  ;;  %v1016_v54 = vrot.slane %v1015_v2, 1 }
 0x19d   : > { %v987_v40 = vadd.f32 %v986_v5, %v980_v48  ;;  %v1001_v25 = vadd.f32 %v1000_v19, %v994_v8 }
 0x19e   : > { %v1011_v38 = vadd.f32 %v1010_v22, %v1009_v29  ;;  %v1017_v44 = vadd.f32 %v1016_v54, %v1015_v2 }
 0x19f   : > { %988 = vst [vmem:[%s1648_s19] sm:$0x1] %v987_v40 }
 0x1a0   : > { %1002 = vst [vmem:[%s1648_s19 + $0x1] sm:$0x1] %v1001_v25  ;;  %v1018_v28 = vadd.f32 %v1017_v44, %v1011_v38 }
 0x1a2   : > { %1019 = vst [vmem:[%s1648_s19 + $0x3] sm:$0x1] %v1018_v28 }
 0x1a3 PF: > { %s12_s13 = sadd.s32 1, %s1460_s13   ;;  %s2471_s9 = smov %s1448_s10 }
 0x1a4   : > { %p9_p11 = scmp.ge.s32.totalorder %s12_s13, 4   ;;  %s2472_s10 = smov %s1529_s18 }
 0x1a5   : > { %s2473_s11 = smov %s1456_s12  ;;  %s2474_s12 = smov %s2476_s14 }
 0x1a6   :  { %11 = sbr.rel (!%p9_p11) target bundleno = 3 (0x3), region = 144 }

</bundles_post_ra>
